<compile_context>
chip_gen: v5e
topology: v5e:2x2
jax: 0.10.0
libtpu: 0.0.40
codegen_flags: <defaults>
</compile_context>

<pallas_src>
import math

import jax
import jax.numpy as jnp
from jax.experimental import pallas as pl
from jax.experimental.pallas import tpu as pltpu


# ------------------------------ Pallas kernel ------------------------------

def _adain_kernel(x_ref, g_ref, b_ref, o_ref):
    # x_ref : (1, Cb, HW)  input tile (one batch element, one channel block)
    # g_ref : (1, Cb, 1)   gamma for this (batch, channel-block), f32
    # b_ref : (1, Cb, 1)   beta  for this (batch, channel-block), f32
    # o_ref : (1, Cb, HW)  output tile (same dtype as x)
    x = x_ref[...].astype(jnp.float32)                 # pass 1: moments
    hw = x.shape[-1]
    inv_n = 1.0 / float(hw)

    # Single-pass instance-norm moments over the spatial (lane) axis, per channel.
    s1 = jnp.sum(x, axis=-1, keepdims=True)            # (1, Cb, 1)
    s2 = jnp.sum(x * x, axis=-1, keepdims=True)        # (1, Cb, 1)
    mean = s1 * inv_n
    var = jnp.maximum(s2 * inv_n - mean * mean, 0.0)   # clamp: guard rsqrt vs cancellation
    inv_std = jax.lax.rsqrt(var + 1e-5)

    # Fold gamma / inv_std / mean / beta into a single per-channel affine.
    gamma = g_ref[...].astype(jnp.float32)
    beta = b_ref[...].astype(jnp.float32)
    scale = gamma * inv_std                            # (1, Cb, 1)
    shift = beta - mean * scale                        # (1, Cb, 1)

    # Pass 2: re-read x from VMEM (stream loads; avoid a whole-tile live range).
    o_ref[...] = (x_ref[...].astype(jnp.float32) * scale + shift).astype(o_ref.dtype)


def _choose_c_block(c, hw, itemsize, batch, tile_cap_bytes=8 << 20):
    """Largest multiple-of-8 divisor of C whose (cb, HW) tile fits the byte cap.

    The cap keeps ~4-5x tile bytes (double-buffered in + out) well inside v7x's
    64 MiB VMEM.  Prefers a choice giving >= 2 total grid steps (v7x: 2 TCs)."""
    divisors = [d for d in range(8, c + 1, 8) if c % d == 0]
    if not divisors:
        return c  # odd channel count: single full-C block (block dim == array dim is legal)
    fitting = [d for d in divisors if d * hw * itemsize <= tile_cap_bytes] or divisors[:1]
    cb = max(fitting)
    if batch * (c // cb) < 2:
        multi = [d for d in fitting if batch * (c // d) >= 2]
        if multi:
            cb = max(multi)
    return cb


def adain_pallas(x3, gamma, beta):
    """x3: (B, C, HW) any float dtype; gamma/beta: (B, C) f32. Returns (B, C, HW)."""
    B, C, HW = x3.shape
    cb = _choose_c_block(C, HW, x3.dtype.itemsize, B)
    n_cb = C // cb

    tile_bytes = cb * HW * x3.dtype.itemsize
    # Explicit scoped-VMEM limit: ~2x in + 2x out buffers + headroom, clamped.
    vmem_limit = int(min(max(32 << 20, 5 * tile_bytes + (2 << 20)), 96 << 20))

    g3 = gamma.astype(jnp.float32).reshape(B, C, 1)
    b3 = beta.astype(jnp.float32).reshape(B, C, 1)

    return pl.pallas_call(
        _adain_kernel,
        out_shape=jax.ShapeDtypeStruct((B, C, HW), x3.dtype),
        grid_spec=pltpu.PrefetchScalarGridSpec(
            num_scalar_prefetch=0,
            grid=(B, n_cb),
            in_specs=[
                pl.BlockSpec((1, cb, HW), lambda b, c: (b, c, 0)),
                pl.BlockSpec((1, cb, 1), lambda b, c: (b, c, 0)),
                pl.BlockSpec((1, cb, 1), lambda b, c: (b, c, 0)),
            ],
            out_specs=pl.BlockSpec((1, cb, HW), lambda b, c: (b, c, 0)),
        ),
        compiler_params=pltpu.CompilerParams(
            dimension_semantics=("parallel", "parallel"),
            vmem_limit_bytes=vmem_limit),
    )(x3, g3, b3)


# --------------------------- module-level wrapper ---------------------------

def init_adain_params(key, in_channel, style_dim):
    """EqualLinear(style_dim, 2*in_channel): equal_lr scale folded into the weight;
    bias[:C] = 1 (gamma head), bias[C:] = 0 (beta head)."""
    scale = math.sqrt(2.0 / style_dim)
    w = jax.random.normal(key, (2 * in_channel, style_dim), jnp.float32) * scale
    b = jnp.concatenate([jnp.ones((in_channel,), jnp.float32),
                         jnp.zeros((in_channel,), jnp.float32)])
    return {"w": w, "b": b}


def adaptive_instance_norm(x_nchw, style, params):
    """PyTorch-facing API: x in NCHW (any float dtype), style (B, S) f32."""
    B, C, H, W = x_nchw.shape
    # EqualLinear style projection hoisted out of the kernel (tiny; fuses in XLA).
    gb = style.astype(jnp.float32) @ params["w"].T + params["b"]       # (B, 2C)
    gamma, beta = gb[:, :C], gb[:, C:]
    x3 = x_nchw.reshape(B, C, H * W)        # free: contiguous NCHW -> (B, C, HW)
    out3 = adain_pallas(x3, gamma, beta)
    return out3.reshape(B, C, H, W)


def adain_reference(x_nchw, style, params):
    """Pure-JAX reference matching the PyTorch module (two-pass moments)."""
    C = x_nchw.shape[1]
    gb = style @ params["w"].T + params["b"]
    gamma, beta = gb[:, :C], gb[:, C:]
    mean = jnp.mean(x_nchw, axis=(2, 3), keepdims=True)
    var = jnp.mean((x_nchw - mean) ** 2, axis=(2, 3), keepdims=True)
    xn = (x_nchw - mean) / jnp.sqrt(var + 1e-5)
    return gamma[:, :, None, None] * xn + beta[:, :, None, None]


# ---------------------------------- main ------------------------------------

if __name__ == "__main__":
    B, C, H, W = 2, 256, 16, 16
    style_dim = 32

    key = jax.random.PRNGKey(0)
    kx, ks, kp = jax.random.split(key, 3)
    x = jax.random.normal(kx, (B, C, H, W), jnp.float32)
    style = jax.random.normal(ks, (B, style_dim), jnp.float32)
    params = init_adain_params(kp, C, style_dim)

    out = jax.block_until_ready(adaptive_instance_norm(x, style, params))
    assert out.shape == (B, C, H, W) and out.dtype == jnp.float32
    assert bool(jnp.all(jnp.isfinite(out)))

    # Tolerance check vs two-pass pure-JAX reference (kernel uses single-pass
    # variance E[x^2]-mean^2, clamped; tiny numerical difference expected).
    ref = adain_reference(x, style, params)
    max_err = float(jnp.max(jnp.abs(out - ref)))
    assert max_err < 1e-3, f"mismatch vs reference: {max_err}"

    # bf16 I/O smoke test (halves bytes moved on the memory-bound roofline;
    # arithmetic stays in f32 inside the kernel).
    out_bf16 = jax.block_until_ready(
        adaptive_instance_norm(x.astype(jnp.bfloat16), style, params))
    assert out_bf16.shape == (B, C, H, W) and out_bf16.dtype == jnp.bfloat16
    assert bool(jnp.all(jnp.isfinite(out_bf16.astype(jnp.float32))))

    print("KERNEL_OK")
</pallas_src>

<mosaic_0001>
module attributes {stable_mosaic.version = 11 : i64} {
  func.func @_adain_kernel(%arg0: i32, %arg1: i32, %arg2: memref<1x256x256xf32, #tpu.memory_space<vmem>>, %arg3: memref<1x256x1xf32, #tpu.memory_space<vmem>>, %arg4: memref<1x256x1xf32, #tpu.memory_space<vmem>>, %arg5: memref<1x256x256xf32, #tpu.memory_space<vmem>>) attributes {dimension_semantics = [#tpu.dimension_semantics<parallel>, #tpu.dimension_semantics<parallel>], iteration_bounds = array<i64: 2, 1>, scalar_prefetch = 0 : i64, scratch_operands = 0 : i64, tpu.core_type = #tpu.core_type<tc>, window_params = [{transform_indices = @transform_0, window_bounds = array<i64: 1, 256, 256>}, {transform_indices = @transform_1, window_bounds = array<i64: 1, 256, 1>}, {transform_indices = @transform_2, window_bounds = array<i64: 1, 256, 1>}, {transform_indices = @transform_3, window_bounds = array<i64: 1, 256, 256>}]} {
    %c0 = arith.constant 0 : index
    %c0_0 = arith.constant 0 : index
    %c0_1 = arith.constant 0 : index
    %0 = vector.load %arg2[%c0, %c0_0, %c0_1] : memref<1x256x256xf32, #tpu.memory_space<vmem>>, vector<1x256x256xf32>
    %cst = arith.constant dense<0.000000e+00> : vector<1x256xf32>
    %1 = vector.multi_reduction <add>, %0, %cst [2] : vector<1x256x256xf32> to vector<1x256xf32>
    %2 = vector.shape_cast %1 : vector<1x256xf32> to vector<1x256x1xf32>
    %3 = arith.mulf %0, %0 : vector<1x256x256xf32>
    %cst_2 = arith.constant dense<0.000000e+00> : vector<1x256xf32>
    %4 = vector.multi_reduction <add>, %3, %cst_2 [2] : vector<1x256x256xf32> to vector<1x256xf32>
    %5 = vector.shape_cast %4 : vector<1x256xf32> to vector<1x256x1xf32>
    %cst_3 = arith.constant 3.906250e-03 : f32
    %6 = vector.broadcast %cst_3 : f32 to vector<1x256x1xf32>
    %7 = arith.mulf %2, %6 : vector<1x256x1xf32>
    %cst_4 = arith.constant 3.906250e-03 : f32
    %8 = vector.broadcast %cst_4 : f32 to vector<1x256x1xf32>
    %9 = arith.mulf %5, %8 : vector<1x256x1xf32>
    %10 = arith.mulf %7, %7 : vector<1x256x1xf32>
    %11 = arith.subf %9, %10 : vector<1x256x1xf32>
    %cst_5 = arith.constant 0.000000e+00 : f32
    %12 = vector.broadcast %cst_5 : f32 to vector<1x256x1xf32>
    %13 = arith.maximumf %11, %12 : vector<1x256x1xf32>
    %cst_6 = arith.constant 9.99999974E-6 : f32
    %14 = vector.broadcast %cst_6 : f32 to vector<1x256x1xf32>
    %15 = arith.addf %13, %14 : vector<1x256x1xf32>
    %16 = math.rsqrt %15 : vector<1x256x1xf32>
    %c0_7 = arith.constant 0 : index
    %c0_8 = arith.constant 0 : index
    %c0_9 = arith.constant 0 : index
    %17 = vector.load %arg3[%c0_7, %c0_8, %c0_9] : memref<1x256x1xf32, #tpu.memory_space<vmem>>, vector<1x256x1xf32>
    %c0_10 = arith.constant 0 : index
    %c0_11 = arith.constant 0 : index
    %c0_12 = arith.constant 0 : index
    %18 = vector.load %arg4[%c0_10, %c0_11, %c0_12] : memref<1x256x1xf32, #tpu.memory_space<vmem>>, vector<1x256x1xf32>
    %19 = arith.mulf %17, %16 : vector<1x256x1xf32>
    %20 = arith.mulf %7, %19 : vector<1x256x1xf32>
    %21 = arith.subf %18, %20 : vector<1x256x1xf32>
    %c0_13 = arith.constant 0 : index
    %c0_14 = arith.constant 0 : index
    %c0_15 = arith.constant 0 : index
    %22 = vector.load %arg2[%c0_13, %c0_14, %c0_15] : memref<1x256x256xf32, #tpu.memory_space<vmem>>, vector<1x256x256xf32>
    %23 = vector.broadcast %19 : vector<1x256x1xf32> to vector<1x256x256xf32>
    %24 = arith.mulf %22, %23 : vector<1x256x256xf32>
    %25 = vector.broadcast %21 : vector<1x256x1xf32> to vector<1x256x256xf32>
    %26 = arith.addf %24, %25 : vector<1x256x256xf32>
    %c0_16 = arith.constant 0 : index
    %c0_17 = arith.constant 0 : index
    %c0_18 = arith.constant 0 : index
    %27 = vector.load %arg5[%c0_16, %c0_17, %c0_18] : memref<1x256x256xf32, #tpu.memory_space<vmem>>, vector<1x256x256xf32>
    tpu.vector_store %arg5[%c0_16, %c0_17, %c0_18], %26 {strides = array<i32>} : memref<1x256x256xf32, #tpu.memory_space<vmem>>, vector<1x256x256xf32>,
    return
  }
  func.func @transform_0(%arg0: i32, %arg1: i32) -> (i32, i32, i32) {
    %c0_i32 = arith.constant 0 : i32
    %c0_i32_0 = arith.constant 0 : i32
    return %arg0, %arg1, %c0_i32 : i32, i32, i32
  }
  func.func @transform_1(%arg0: i32, %arg1: i32) -> (i32, i32, i32) {
    %c0_i32 = arith.constant 0 : i32
    %c0_i32_0 = arith.constant 0 : i32
    return %arg0, %arg1, %c0_i32 : i32, i32, i32
  }
  func.func @transform_2(%arg0: i32, %arg1: i32) -> (i32, i32, i32) {
    %c0_i32 = arith.constant 0 : i32
    %c0_i32_0 = arith.constant 0 : i32
    return %arg0, %arg1, %c0_i32 : i32, i32, i32
  }
  func.func @transform_3(%arg0: i32, %arg1: i32) -> (i32, i32, i32) {
    %c0_i32 = arith.constant 0 : i32
    %c0_i32_0 = arith.constant 0 : i32
    return %arg0, %arg1, %c0_i32 : i32, i32, i32
  }
}

</mosaic_0001>

<bundles_post_ra>
// kernel: tpu_custom_call.1
= control target key start
LH: loop header
LB: loop body
LE: loop exit
PB: predicated region body
PF: predicated region fallthrough
CT: control target
= control target key end

     0   :  { %8 = vsyncpa [#allocation3], 0  ;;  %s4073_s0 = inlined_call_operand.vmem [shape: f32[2,256,256], index: 0, kind: input, shape index: {}]   ;;  %s4074_s1 = inlined_call_operand.vmem [shape: f32[2,256,1], index: 1, kind: input, shape index: {}]   ;;  %s4075_s2 = inlined_call_operand.vmem [shape: f32[2,256,1], index: 2, kind: input, shape index: {}]   ;;  %s4076_s3 = inlined_call_operand.hbm [shape: f32[2,256,256], index: 3, kind: output, shape index: {}]  }
   0x1   :  { %10 = vsyncpa [#allocation3 + $0x1], 0  ;;  %s2229_s12 = smov 0   ;;  %s2231_s13 = smov 0  }
   0x2   :  { %s2233_s14 = smov 0   ;;  %s2235_s15 = smov 0  }
   0x3   :  { %s2237_s16 = smov 0   ;;  %s2239_s17 = smov 0  }
   0x4 LB: > { %s1916_s18 = sadd.s32 4294967295, %s2204_s17   ;;  %s1917_s19 = sadd.s32 4294967294, %s2204_s17   ;;  %s2204_s17 = sphi %s2239_s17, %s16_s17   ;;  %s2200_s16 = sphi %s2237_s16, %s4224_s16   ;;  %s2196_s15 = sphi %s2235_s15, %s4223_s15   ;;  %s2192_s14 = sphi %s2233_s14, %s4222_s14   ;;  %s2188_s13 = sphi %s2231_s13, %s4221_s13   ;;  %s2184_s12 = sphi %s2229_s12, %s4220_s12  }
   0x5   : > { %s28_s20 = sadd.s32 1, %s2200_s16  ;;  %s121_s21 = sadd.s32 1, %s2192_s14 }
   0x6   : > { %p30_p0 = scmp.ge.s32.totalorder %s28_s20, 2  ;;  %p131_p1 = scmp.ne.s32.totalorder %s2192_s14, %s2188_s13 }
   0x7   : > { %p132_p2 = scmp.eq.s32.totalorder %s1916_s18, 1  ;;  %p137_p3 = scmp.ne.s32.totalorder %s2188_s13, %s2184_s12 }
   0x8   : > { %s4226_s20 = smov (%p30_p0, %s28_s20), 0  ;;  %p138_p5 = scmp.eq.s32.totalorder %s1917_s19, 1 }
   0x9   : > { %p2269_p4 = por %p132_p2, %p131_p1  ;;  %s116_s23 = ssub.s32 %s2200_s16, %s4226_s20 }
   0xa   : > { %p1920_p6 = scmp.ge.s32.totalorder %s2204_s17, 1  ;;  %p119_p7 = scmp.eq.s32.totalorder %s116_s23, 0 }
   0xb   : > { %p2276_p8 = por %p138_p5, %p137_p3  ;;  %p196_p9 = scmp.lt.s32.totalorder %s2204_s17, 3 }
   0xc   : > { %s2282_s25 = scalar_select %p119_p7, %s2192_s14, %s121_s21  }
   0xd   : > { %p197_p10 = pnand %p1920_p6, %p196_p9 }
   0xf   : > { %200 = sbr.rel (%p197_p10) target bundleno = 574 (0x23e), region = 32 }
  0x14   : > { %p244_p11 = scmp.lt.s32.totalorder %s2196_s15, 1  ;;  %s240_s11 = sand.u32 1, %s2188_s13  }
  0x15   : > { %s1921_s18 = sshll.u32 %s240_s11, 9  ;;  %s1936_s21 = sshll.u32 %s2196_s15, 9 }
  0x16   : > { %s2286_s26 = scalar_select %p244_p11, %s2196_s15, 1 }
  0x17   : > { %s3842_s19 = scalar_lea.vmem [#allocation2], %s1921_s18  ;;  %s1780_s15 = scalar_lea.sflag [#allocation3], %s240_s11 }
  0x18   : > { %s1933_s27 = sshll.u32 %s2286_s26, 9  ;;  %s1934_s4 = sshll.u32 %s2286_s26, 8 }
  0x19   : > { %s2292_s30 = scalar_lea.vmem %s4073_s0, %s1933_s27  ;;  %s2960_s7 = scalar_lea.vmem %s4074_s1, %s1934_s4 }
  0x1a   : > { %v2295_v0 = vld [vmem:[%s2292_s30 + $0x40] sm:$0xff]  ;;  %v2298_v1 = vld [vmem:[%s2292_s30 + $0x48] sm:$0xff]  ;;  %v2319_v9 = vld [vmem:[%s2292_s30 + $0x50] sm:$0xff]  ;;  %s3656_s10 = scalar_lea.vmem %s4075_s2, %s1934_s4  ;;  %s1794_s27 = scalar_lea.hbm %s4076_s3, %s1936_s21 }
  0x1b   : > { %v2301_v2 = vld [vmem:[%s2292_s30 + $0x20] sm:$0xff]  ;;  %v351_v3 = vadd.f32 %v2298_v1, %v2295_v0  ;;  %v2306_v4 = vld [vmem:[%s2292_s30 + $0x28] sm:$0xff]  ;;  %v2322_v10 = vld [vmem:[%s2292_s30 + $0x58] sm:$0xff]  ;;  %s1795_s28 = sshll.u32 %s3842_s19, 4  ;;  %s1797_s29 = sshll.u32 %s1794_s27, 4  ;;  %s1796_s28 = int_to_ptr.vmem [resolvable:$true] %s1795_s28  ;;  %s1798_s29 = int_to_ptr.hbm [resolvable:$true] %s1797_s29 }
  0x1c   : > { %v2309_v5 = vld [vmem:[%s2292_s30] sm:$0xff]  ;;  %v2312_v6 = vld [vmem:[%s2292_s30 + $0x8] sm:$0xff]  ;;  %v345_v7 = vadd.f32 %v2306_v4, %v2301_v2  ;;  %v2325_v11 = vld [vmem:[%s2292_s30 + $0x30] sm:$0xff]  ;;  %v354_v15 = vadd.f32 %v2322_v10, %v2319_v9  ;;  %s2140_s4 = sshra.s32 %s1798_s29, 4  ;;  %s2141_s4 = int_to_ptr.hbm [resolvable:$true] %s2140_s4 }
  0x1d   : > { %v339_v8 = vadd.f32 %v2312_v6, %v2309_v5  ;;  %352 = vadd.xlane.f32.xlu2 %v351_v3  ;;  %v2328_v12 = vld [vmem:[%s2292_s30 + $0x38] sm:$0xff]  ;;  %v2331_v13 = vld [vmem:[%s2292_s30 + $0x10] sm:$0xff]  ;;  %v2343_v18 = vld [vmem:[%s2292_s30 + $0x80] sm:$0xff]  ;;  %s2142_s5 = scalar_lea.hbm %s2141_s4, 512  ;;  %p2147_p1 = scmp.lt.s32.totalorder %s2141_s4, %s4076_s3 }
  0x1e   : > { %346 = vadd.xlane.f32.xlu1 %v345_v7  ;;  %v2334_v14 = vld [vmem:[%s2292_s30 + $0x18] sm:$0xff]  ;;  %v348_v16 = vadd.f32 %v2328_v12, %v2325_v11  ;;  %v2346_v19 = vld [vmem:[%s2292_s30 + $0x88] sm:$0xff]  ;;  %v2349_v20 = vld [vmem:[%s2292_s30 + $0x70] sm:$0xff]  ;;  %p2143_p12 = scmp.ne.s32.totalorder %s2141_s4, %s2142_s5 }
  0x1f   : > { %340 = vadd.xlane.f32.xlu0 %v339_v8  ;;  %v342_v17 = vadd.f32 %v2334_v14, %v2331_v13  ;;  %v2352_v21 = vld [vmem:[%s2292_s30 + $0x78] sm:$0xff]  ;;  %v2355_v22 = vld [vmem:[%s2292_s30 + $0x60] sm:$0xff]  ;;  %v2358_v23 = vld [vmem:[%s2292_s30 + $0x68] sm:$0xff]  ;;  %v363_v24 = vadd.f32 %v2346_v19, %v2343_v18 }
  0x20   : > { %v360_v25 = vadd.f32 %v2352_v21, %v2349_v20  ;;  %v357_v26 = vadd.f32 %v2358_v23, %v2355_v22  ;;  %v2367_v27 = vld [vmem:[%s2292_s30 + $0xb0] sm:$0xff]  ;;  %v2370_v28 = vld [vmem:[%s2292_s30 + $0xb8] sm:$0xff]  ;;  %v2373_v29 = vld [vmem:[%s2292_s30 + $0xa0] sm:$0xff]  ;;  %p2144_p13 = pnand %p2143_p12, %p2269_p4 }
  0x21   : > { %v2376_v30 = vld [vmem:[%s2292_s30 + $0xa8] sm:$0xff]  ;;  %v2379_v31 = vld [vmem:[%s2292_s30 + $0x90] sm:$0xff]  ;;  %v2382_v32 = vld [vmem:[%s2292_s30 + $0x98] sm:$0xff]  ;;  %v372_v33 = vadd.f32 %v2370_v28, %v2367_v27 }
  0x22   : > { %v369_v34 = vadd.f32 %v2376_v30, %v2373_v29  ;;  %v366_v35 = vadd.f32 %v2382_v32, %v2379_v31  ;;  %v2391_v36 = vld [vmem:[%s2292_s30 + $0xe0] sm:$0xff]  ;;  %v2394_v37 = vld [vmem:[%s2292_s30 + $0xe8] sm:$0xff]  ;;  %v2397_v38 = vld [vmem:[%s2292_s30 + $0xd0] sm:$0xff]  ;;  %p2145_p0 = pneg %p2144_p13 }
  0x23   : > { %v2400_v39 = vld [vmem:[%s2292_s30 + $0xd8] sm:$0xff]  ;;  %v2403_v40 = vld [vmem:[%s2292_s30 + $0xc0] sm:$0xff]  ;;  %v2406_v41 = vld [vmem:[%s2292_s30 + $0xc8] sm:$0xff]  ;;  %v381_v42 = vadd.f32 %v2394_v37, %v2391_v36 }
  0x24   : > { %v378_v43 = vadd.f32 %v2400_v39, %v2397_v38  ;;  %v375_v44 = vadd.f32 %v2406_v41, %v2403_v40  ;;  %v2415_v45 = vld [vmem:[%s2292_s30 + $0x110] sm:$0xff]  ;;  %v2418_v46 = vld [vmem:[%s2292_s30 + $0x118] sm:$0xff]  ;;  %v2421_v47 = vld [vmem:[%s2292_s30 + $0x100] sm:$0xff] }
  0x25   : > { %355 = vadd.xlane.f32.xlu2 %v354_v15  ;;  %v2424_v48 = vld [vmem:[%s2292_s30 + $0x108] sm:$0xff]  ;;  %v2427_v49 = vld [vmem:[%s2292_s30 + $0xf0] sm:$0xff]  ;;  %v2430_v50 = vld [vmem:[%s2292_s30 + $0xf8] sm:$0xff]  ;;  %v390_v51 = vadd.f32 %v2418_v46, %v2415_v45 }
  0x26   : > { %349 = vadd.xlane.f32.xlu1 %v348_v16  ;;  %v387_v52 = vadd.f32 %v2424_v48, %v2421_v47  ;;  %v384_v53 = vadd.f32 %v2430_v50, %v2427_v49  ;;  %v2439_v54 = vld [vmem:[%s2292_s30 + $0x140] sm:$0xff]  ;;  %v2442_v55 = vld [vmem:[%s2292_s30 + $0x148] sm:$0xff]  ;;  %v2445_v56 = vld [vmem:[%s2292_s30 + $0x130] sm:$0xff] }
  0x27   : > { %343 = vadd.xlane.f32.xlu0 %v342_v17  ;;  %v2448_v57 = vld [vmem:[%s2292_s30 + $0x138] sm:$0xff]  ;;  %v2451_v58 = vld [vmem:[%s2292_s30 + $0x120] sm:$0xff]  ;;  %v2454_v59 = vld [vmem:[%s2292_s30 + $0x128] sm:$0xff]  ;;  %v399_v60 = vadd.f32 %v2442_v55, %v2439_v54 }
  0x28   : > { %v396_v61 = vadd.f32 %v2448_v57, %v2445_v56  ;;  %v393_v62 = vadd.f32 %v2454_v59, %v2451_v58  ;;  %v2463_v63 = vld [vmem:[%s2292_s30 + $0x170] sm:$0xff]  ;;  %v2466_v3 = vld [vmem:[%s2292_s30 + $0x178] sm:$0xff]  ;;  %v2469_v7 = vld [vmem:[%s2292_s30 + $0x160] sm:$0xff] }
  0x29   : > { %v2472_v8 = vld [vmem:[%s2292_s30 + $0x168] sm:$0xff]  ;;  %v2475_v15 = vld [vmem:[%s2292_s30 + $0x150] sm:$0xff]  ;;  %v2478_v16 = vld [vmem:[%s2292_s30 + $0x158] sm:$0xff]  ;;  %v408_v17 = vadd.f32 %v2466_v3, %v2463_v63 }
  0x2d   : > { %364 = vadd.xlane.f32.xlu2 %v363_v24  ;;  %v405_v24 = vadd.f32 %v2472_v8, %v2469_v7 }
  0x2e   : > { %361 = vadd.xlane.f32.xlu1 %v360_v25  ;;  %v402_v25 = vadd.f32 %v2478_v16, %v2475_v15 }
  0x2f   : > { %358 = vadd.xlane.f32.xlu0 %v357_v26  ;;  %v2487_v26 = vld [vmem:[%s2292_s30 + $0x1a0] sm:$0xff] }
  0x35   : > { %373 = vadd.xlane.f32.xlu2 %v372_v33  ;;  %v2490_v33 = vld [vmem:[%s2292_s30 + $0x1a8] sm:$0xff] }
  0x36   : > { %370 = vadd.xlane.f32.xlu1 %v369_v34  ;;  %4117 = vst [vmem:[#allocation5_spill] sm:$0xff] %v2490_v33  ;;  %v2493_v34 = vld [vmem:[%s2292_s30 + $0x190] sm:$0xff] }
  0x37   : > { %367 = vadd.xlane.f32.xlu0 %v366_v35  ;;  %4118 = vst [vmem:[#allocation6_spill] sm:$0xff] %v2493_v34  ;;  %v2496_v35 = vld [vmem:[%s2292_s30 + $0x198] sm:$0xff] }
  0x38   : > { %4119 = vst [vmem:[#allocation7_spill] sm:$0xff] %v2496_v35 }
  0x3d   : > { %382 = vadd.xlane.f32.xlu2 %v381_v42  ;;  %v2499_v42 = vld [vmem:[%s2292_s30 + $0x180] sm:$0xff] }
  0x3e   : > { %379 = vadd.xlane.f32.xlu1 %v378_v43  ;;  %v2502_v43 = vld [vmem:[%s2292_s30 + $0x188] sm:$0xff] }
  0x3f   : > { %376 = vadd.xlane.f32.xlu0 %v375_v44  ;;  %v417_v44 = vadd.f32 %v2490_v33, %v2487_v26  ;;  %v2542_v33 = vld [vmem:[%s2292_s30 + $0x1f8] sm:$0xff] }
  0x40   : > { %4124 = vst [vmem:[#allocation12_spill] sm:$0xff] %v2542_v33 }
  0x45   : > { %391 = vadd.xlane.f32.xlu2 %v390_v51  ;;  %v414_v51 = vadd.f32 %v2496_v35, %v2493_v34  ;;  %v436_v35 = vmul.f32 %v2312_v6, %v2312_v6  ;;  %v2539_v34 = vld [vmem:[%s2292_s30 + $0x1f0] sm:$0xff]  ;;  %v439_v6 = vmul.f32 %v2301_v2, %v2301_v2 }
  0x46   : > { %388 = vadd.xlane.f32.xlu1 %v387_v52  ;;  %v411_v52 = vadd.f32 %v2502_v43, %v2499_v42  ;;  %4123 = vst [vmem:[#allocation11_spill] sm:$0xff] %v2539_v34 }
  0x47   : > { %385 = vadd.xlane.f32.xlu0 %v384_v53  ;;  %v2511_v53 = vld [vmem:[%s2292_s30 + $0x1d0] sm:$0xff] }
  0x48   : > { %4120 = vst [vmem:[#allocation8_spill] sm:$0xff] %v2511_v53 }
  0x4d   : > { %400 = vadd.xlane.f32.xlu2 %v399_v60  ;;  %v2514_v60 = vld [vmem:[%s2292_s30 + $0x1d8] sm:$0xff] }
  0x4e   : > { %397 = vadd.xlane.f32.xlu1 %v396_v61  ;;  %4121 = vst [vmem:[#allocation9_spill] sm:$0xff] %v2514_v60  ;;  %v2517_v61 = vld [vmem:[%s2292_s30 + $0x1c0] sm:$0xff] }
  0x4f   : > { %394 = vadd.xlane.f32.xlu0 %v393_v62  ;;  %v2520_v62 = vld [vmem:[%s2292_s30 + $0x1c8] sm:$0xff] }
  0x50   : > { %4122 = vst [vmem:[#allocation10_spill] sm:$0xff] %v2520_v62 }
  0x55   : > { %409 = vadd.xlane.f32.xlu2 %v408_v17  ;;  %v2523_v17 = vld [vmem:[%s2292_s30 + $0x1b0] sm:$0xff] }
  0x56   : > { %406 = vadd.xlane.f32.xlu1 %v405_v24  ;;  %v2526_v24 = vld [vmem:[%s2292_s30 + $0x1b8] sm:$0xff] }
  0x57   : > { %403 = vadd.xlane.f32.xlu0 %v402_v25  ;;  %v426_v25 = vadd.f32 %v2514_v60, %v2511_v53  ;;  %v2545_v60 = vld [vmem:[%s2292_s30 + $0x1e0] sm:$0xff]  ;;  %v2548_v53 = vld [vmem:[%s2292_s30 + $0x1e8] sm:$0xff] }
  0x5d   : > { %418 = vadd.xlane.f32.xlu2 %v417_v44  ;;  %v423_v44 = vadd.f32 %v2520_v62, %v2517_v61 }
  0x5e   : > { %415 = vadd.xlane.f32.xlu1 %v414_v51  ;;  %v420_v51 = vadd.f32 %v2526_v24, %v2523_v17 }
  0x5f   : > { %412 = vadd.xlane.f32.xlu0 %v411_v52  ;;  %v435_v52 = vmul.f32 %v2309_v5, %v2309_v5  ;;  %v429_v5 = vadd.f32 %v2548_v53, %v2545_v60 }
  0x61   : > { %v499_v62 = vadd.f32 %v436_v35, %v435_v52  ;;  %v440_v35 = vmul.f32 %v2306_v4, %v2306_v4  ;;  %v437_v52 = vmul.f32 %v2331_v13, %v2331_v13  ;;  %v446_v4 = vmul.f32 %v2322_v10, %v2322_v10 }
  0x62   : > { %v443_v13 = vmul.f32 %v2295_v0, %v2295_v0  ;;  %v452_v0 = vmul.f32 %v2346_v19, %v2346_v19  ;;  %v450_v10 = vmul.f32 %v2352_v21, %v2352_v21  ;;  %v458_v19 = vmul.f32 %v2370_v28, %v2370_v28 }
  0x63   : > { %v456_v21 = vmul.f32 %v2376_v30, %v2376_v30  ;;  %v464_v28 = vmul.f32 %v2394_v37, %v2394_v37  ;;  %v462_v30 = vmul.f32 %v2400_v39, %v2400_v39  ;;  %v471_v37 = vmul.f32 %v2451_v58, %v2451_v58 }
  0x64   : > { %v470_v39 = vmul.f32 %v2418_v46, %v2418_v46  ;;  %v477_v46 = vmul.f32 %v2475_v15, %v2475_v15 }
  0x65   : > { %427 = vadd.xlane.f32.xlu2 %v426_v25  ;;  %v432_v25 = vadd.f32 %v2542_v33, %v2539_v34  ;;  %v505_v34 = vadd.f32 %v440_v35, %v439_v6 }
  0x66   : > { %424 = vadd.xlane.f32.xlu1 %v423_v44  ;;  %v441_v44 = vmul.f32 %v2325_v11, %v2325_v11  ;;  %v445_v11 = vmul.f32 %v2319_v9, %v2319_v9 }
  0x67   : > { %421 = vadd.xlane.f32.xlu0 %v420_v51  ;;  %v442_v51 = vmul.f32 %v2328_v12, %v2328_v12  ;;  %v447_v12 = vmul.f32 %v2355_v22, %v2355_v22  ;;  %v451_v22 = vmul.f32 %v2343_v18, %v2343_v18 }
  0x69   : > { %v508_v33 = vadd.f32 %v442_v51, %v441_v44  ;;  %v523_v44 = vadd.f32 %v452_v0, %v451_v22  ;;  %v460_v51 = vmul.f32 %v2406_v41, %v2406_v41  ;;  %v465_v41 = vmul.f32 %v2427_v49, %v2427_v49 }
  0x6a   : > { %v473_v22 = vmul.f32 %v2445_v56, %v2445_v56  ;;  %v484_v56 = vmul.f32 %v2502_v43, %v2502_v43 }
  0x6d   : > { %500 = vadd.xlane.f32.xlu2 %v499_v62  ;;  %v438_v62 = vmul.f32 %v2334_v14, %v2334_v14  ;;  %v444_v14 = vmul.f32 %v2298_v1, %v2298_v1  ;;  %v449_v1 = vmul.f32 %v2349_v20, %v2349_v20  ;;  %v455_v20 = vmul.f32 %v2373_v29, %v2373_v29 }
  0x6e   : > { %433 = vadd.xlane.f32.xlu1 %v432_v25  ;;  %v448_v25 = vmul.f32 %v2358_v23, %v2358_v23  ;;  %v453_v23 = vmul.f32 %v2379_v31, %v2379_v31  ;;  %v457_v31 = vmul.f32 %v2367_v27, %v2367_v27  ;;  %v461_v29 = vmul.f32 %v2397_v38, %v2397_v38 }
  0x6f   : > { %430 = vadd.xlane.f32.xlu0 %v429_v5  ;;  %v502_v2 = vadd.f32 %v438_v62, %v437_v52  ;;  %v514_v5 = vadd.f32 %v446_v4, %v445_v11  ;;  %v511_v9 = vadd.f32 %v444_v14, %v443_v13  ;;  %v520_v18 = vadd.f32 %v450_v10, %v449_v1 }
  0x70   : > { %v532_v52 = vadd.f32 %v458_v19, %v457_v31  ;;  %v529_v27 = vadd.f32 %v456_v21, %v455_v20  ;;  %v466_v62 = vmul.f32 %v2430_v50, %v2430_v50  ;;  %v538_v50 = vadd.f32 %v462_v30, %v461_v29  ;;  %v4126_v20 = vld [vmem:[#allocation6_spill] sm:$0xff] }
  0x71   : > { %v472_v38 = vmul.f32 %v2454_v59, %v2454_v59  ;;  %v467_v4 = vmul.f32 %v2421_v47, %v2421_v47  ;;  %v468_v13 = vmul.f32 %v2424_v48, %v2424_v48  ;;  %v478_v47 = vmul.f32 %v2478_v16, %v2478_v16 }
  0x72   : > { %v544_v49 = vadd.f32 %v466_v62, %v465_v41  ;;  %v476_v48 = vmul.f32 %v2442_v55, %v2442_v55  ;;  %v481_v10 = vmul.f32 %v2463_v63, %v2463_v63  ;;  %v483_v55 = vmul.f32 %v2499_v42, %v2499_v42  ;;  %v4128_v62 = vld [vmem:[#allocation8_spill] sm:$0xff] }
  0x73   : > { %v553_v58 = vadd.f32 %v472_v38, %v471_v37  ;;  %v547_v59 = vadd.f32 %v468_v13, %v467_v4  ;;  %v562_v15 = vadd.f32 %v478_v47, %v477_v46  ;;  %v485_v21 = vmul.f32 %v4126_v20, %v4126_v20 }
  0x74   : > { %v571_v42 = vadd.f32 %v484_v56, %v483_v55  ;;  %v495_v29 = vmul.f32 %v2545_v60, %v2545_v60  ;;  %v496_v30 = vmul.f32 %v2548_v53, %v2548_v53 }
  0x75   : > { %509 = vadd.xlane.f32.xlu2 %v508_v33  ;;  %v517_v33 = vadd.f32 %v448_v25, %v447_v12  ;;  %v469_v25 = vmul.f32 %v2415_v45, %v2415_v45 }
  0x76   : > { %506 = vadd.xlane.f32.xlu1 %v505_v34  ;;  %v454_v34 = vmul.f32 %v2382_v32, %v2382_v32  ;;  %v459_v32 = vmul.f32 %v2403_v40, %v2403_v40  ;;  %v463_v40 = vmul.f32 %v2391_v36, %v2391_v36  ;;  %v589_v60 = vadd.f32 %v496_v30, %v495_v29 }
  0x77   : > { %503 = vadd.xlane.f32.xlu0 %v502_v2 }
  0x78   : > { %v526_v6 = vadd.f32 %v454_v34, %v453_v23  ;;  %v535_v35 = vadd.f32 %v460_v51, %v459_v32  ;;  %v541_v12 = vadd.f32 %v464_v28, %v463_v40  ;;  %v474_v23 = vmul.f32 %v2448_v57, %v2448_v57 }
  0x79   : > { %v482_v57 = vmul.f32 %v2466_v3, %v2466_v3  ;;  %v487_v51 = vmul.f32 %v2487_v26, %v2487_v26  ;;  %v489_v3 = vmul.f32 %v2523_v17, %v2523_v17  ;;  %v493_v28 = vmul.f32 %v4128_v62, %v4128_v62 }
  0x7a   : > { %v556_v16 = vadd.f32 %v474_v23, %v473_v22 }
  0x7b   : > { %v568_v32 = vadd.f32 %v482_v57, %v481_v10 }
  0x7d   : > { %518 = vadd.xlane.f32.xlu2 %v517_v33 }
  0x7e   : > { %515 = vadd.xlane.f32.xlu1 %v514_v5  ;;  %v550_v5 = vadd.f32 %v470_v39, %v469_v25  ;;  %v4130_v25 = vld [vmem:[#allocation10_spill] sm:$0xff] }
  0x7f   : > { %512 = vadd.xlane.f32.xlu0 %v511_v9  ;;  %v475_v9 = vmul.f32 %v2439_v54, %v2439_v54  ;;  %v492_v37 = vmul.f32 %v4130_v25, %v4130_v25 }
  0x81   : > { %v559_v1 = vadd.f32 %v476_v48, %v475_v9 }
  0x85   : > { %527 = vadd.xlane.f32.xlu2 %v526_v6  ;;  %v479_v6 = vmul.f32 %v2469_v7, %v2469_v7  ;;  %v490_v7 = vmul.f32 %v2526_v24, %v2526_v24 }
  0x86   : > { %524 = vadd.xlane.f32.xlu1 %v523_v44  ;;  %v480_v44 = vmul.f32 %v2472_v8, %v2472_v8  ;;  %v4125_v8 = vld [vmem:[#allocation5_spill] sm:$0xff] }
  0x87   : > { %521 = vadd.xlane.f32.xlu0 %v520_v18  ;;  %v488_v19 = vmul.f32 %v4125_v8, %v4125_v8  ;;  %v580_v17 = vadd.f32 %v490_v7, %v489_v3  ;;  %v2206_v3 = vmov 0  }
  0x88   : > { %v565_v43 = vadd.f32 %v480_v44, %v479_v6  ;;  %1995 = vset.pattern.permute.xlu1 %v2206_v3  ;;  %1997 = vset.pattern.permute.xlu0 %v2206_v3 }
  0x89   : > { %v577_v41 = vadd.f32 %v488_v19, %v487_v51  ;;  %1996 = vset.pattern.permute.xlu2 %v2206_v3 }
  0x8d   : > { %536 = vadd.xlane.f32.xlu2 %v535_v35  ;;  %v4127_v35 = vld [vmem:[#allocation7_spill] sm:$0xff] }
  0x8e   : > { %533 = vadd.xlane.f32.xlu1 %v532_v52  ;;  %v486_v52 = vmul.f32 %v4127_v35, %v4127_v35 }
  0x8f   : > { %530 = vadd.xlane.f32.xlu0 %v529_v27 }
  0x90   : > { %v2614_v2 = vpop.xlane.xlu2 %352  ;;  %v574_v24 = vadd.f32 %v486_v52, %v485_v21 }
  0x91   : > { %v2616_v36 = vpop.xlane.xlu1 %346  ;;  %v2748_v7 = vmul.f32 0.00390625, %v2614_v2 }
  0x92   : > { %v2618_v11 = vpop.xlane.xlu0 %340  ;;  %v2751_v8 = vmul.f32 0.00390625, %v2616_v36 }
  0x93   : > { %v2739_v6 = vmul.f32 0.00390625, %v2618_v11  ;;  %v2767_v2 = vmul.f32 %v2748_v7, %v2748_v7 }
  0x94   : > { %4133 = vst [vmem:[#allocation5_spill] sm:$0xff] %v2751_v8  ;;  %v661_v36 = vmul.f32 %v2751_v8, %v2751_v8 }
  0x95   : > { %545 = vadd.xlane.f32.xlu2 %v544_v49  ;;  %v4129_v49 = vld [vmem:[#allocation9_spill] sm:$0xff] }
  0x96   : > { %542 = vadd.xlane.f32.xlu1 %v541_v12  ;;  %v494_v12 = vmul.f32 %v4129_v49, %v4129_v49 }
  0x97   : > { %539 = vadd.xlane.f32.xlu0 %v538_v50  ;;  %v491_v50 = vmul.f32 %v2517_v61, %v2517_v61 }
  0x98   : > { %v2632_v14 = vpop.xlane.xlu2 %355  ;;  %v586_v13 = vadd.f32 %v494_v12, %v493_v28 }
  0x99   : > { %v2634_v45 = vpop.xlane.xlu1 %349  ;;  %v583_v53 = vadd.f32 %v492_v37, %v491_v50  ;;  %v2754_v11 = vmul.f32 0.00390625, %v2632_v14 }
  0x9a   : > { %v2636_v33 = vpop.xlane.xlu0 %343  ;;  %v2757_v19 = vmul.f32 0.00390625, %v2634_v45 }
  0x9b   : > { %4134 = vst [vmem:[#allocation6_spill] sm:$0xff] %v2754_v11  ;;  %v2760_v21 = vmul.f32 0.00390625, %v2636_v33  ;;  %v2773_v14 = vmul.f32 %v2754_v11, %v2754_v11 }
  0x9c   : > { %v662_v45 = vmul.f32 %v2757_v19, %v2757_v19 }
  0x9d   : > { %554 = vadd.xlane.f32.xlu2 %v553_v58  ;;  %v4131_v58 = vld [vmem:[#allocation11_spill] sm:$0xff] }
  0x9e   : > { %551 = vadd.xlane.f32.xlu1 %v550_v5  ;;  %v497_v5 = vmul.f32 %v4131_v58, %v4131_v58 }
  0x9f   : > { %548 = vadd.xlane.f32.xlu0 %v547_v59  ;;  %v4132_v59 = vld [vmem:[#allocation12_spill] sm:$0xff] }
  0xa0   : > { %v2650_v34 = vpop.xlane.xlu2 %364  ;;  %v498_v61 = vmul.f32 %v4132_v59, %v4132_v59 }
  0xa1   : > { %v2652_v54 = vpop.xlane.xlu1 %361  ;;  %v2763_v35 = vmul.f32 0.00390625, %v2650_v34 }
  0xa2   : > { %v2654_v0 = vpop.xlane.xlu0 %358  ;;  %v592_v48 = vadd.f32 %v498_v61, %v497_v5  ;;  %v2778_v33 = vmul.f32 0.00390625, %v2652_v54 }
  0xa3   : > { %4135 = vst [vmem:[#allocation7_spill] sm:$0xff] %v2763_v35 }
  0xa5   : > { %563 = vadd.xlane.f32.xlu2 %v562_v15 }
  0xa6   : > { %560 = vadd.xlane.f32.xlu1 %v559_v1 }
  0xa7   : > { %557 = vadd.xlane.f32.xlu0 %v556_v16 }
  0xa8   : > { %v2668_v18 = vpop.xlane.xlu2 %373 }
  0xa9   : > { %v2670_v63 = vpop.xlane.xlu1 %370  ;;  %v2792_v62 = vmul.f32 0.00390625, %v2668_v18 }
  0xaa   : > { %v2672_v31 = vpop.xlane.xlu0 %367  ;;  %v2795_v29 = vmul.f32 0.00390625, %v2670_v63  ;;  %v2809_v63 = vmul.f32 %v2778_v33, %v2778_v33 }
  0xab   : > { %4137 = vst [vmem:[#allocation9_spill] sm:$0xff] %v2792_v62  ;;  %v2798_v54 = vmul.f32 0.00390625, %v2672_v31  ;;  %v2826_v58 = vmul.f32 %v2792_v62, %v2792_v62 }
  0xac   : > { %4138 = vst [vmem:[#allocation10_spill] sm:$0xff] %v2795_v29 }
  0xad   : > { %572 = vadd.xlane.f32.xlu2 %v571_v42  ;;  %v659_v42 = vmul.f32 %v2739_v6, %v2739_v6  ;;  %4139 = vst [vmem:[#allocation11_spill] sm:$0xff] %v2798_v54 }
  0xae   : > { %569 = vadd.xlane.f32.xlu1 %v568_v32 }
  0xaf   : > { %566 = vadd.xlane.f32.xlu0 %v565_v43 }
  0xb0   : > { %v2686_v27 = vpop.xlane.xlu2 %382 }
  0xb1   : > { %v2688_v26 = vpop.xlane.xlu1 %379  ;;  %v2802_v50 = vmul.f32 0.00390625, %v2686_v27 }
  0xb2   : > { %v2690_v40 = vpop.xlane.xlu0 %376 }
  0xb3   : > { %4140 = vst [vmem:[#allocation12_spill] sm:$0xff] %v2802_v50  ;;  %v2812_v31 = vmul.f32 0.00390625, %v2690_v40  ;;  %v2830_v40 = vmul.f32 %v2795_v29, %v2795_v29  ;;  %v2838_v59 = vmul.f32 %v2802_v50, %v2802_v50 }
  0xb5   : > { %581 = vadd.xlane.f32.xlu2 %v580_v17  ;;  %v660_v17 = vmul.f32 %v2760_v21, %v2760_v21  ;;  %4142 = vst [vmem:[#allocation14_spill] sm:$0xff] %v2812_v31 }
  0xb6   : > { %578 = vadd.xlane.f32.xlu1 %v577_v41  ;;  %v2786_v41 = vmul.f32 %v2763_v35, %v2763_v35 }
  0xb7   : > { %575 = vadd.xlane.f32.xlu0 %v574_v24  ;;  %v2789_v24 = vmul.f32 0.00390625, %v2654_v0  ;;  %v2805_v0 = vmul.f32 0.00390625, %v2688_v26 }
  0xb8   : > { %v2704_v38 = vpop.xlane.xlu2 %391 }
  0xb9   : > { %v2706_v39 = vpop.xlane.xlu1 %388  ;;  %4136 = vst [vmem:[#allocation8_spill] sm:$0xff] %v2789_v24  ;;  %v2815_v37 = vmul.f32 0.00390625, %v2704_v38  ;;  %v2819_v27 = vmul.f32 %v2789_v24, %v2789_v24  ;;  %v2834_v38 = vmul.f32 %v2798_v54, %v2798_v54 }
  0xba   : > { %v2708_v4 = vpop.xlane.xlu0 %385  ;;  %4141 = vst [vmem:[#allocation13_spill] sm:$0xff] %v2805_v0  ;;  %v2822_v26 = vmul.f32 0.00390625, %v2706_v39  ;;  %v2842_v39 = vmul.f32 %v2805_v0, %v2805_v0 }
  0xbb   : > { %4143 = vst [vmem:[#allocation15_spill] sm:$0xff] %v2815_v37  ;;  %v2855_v3 = vmul.f32 0.00390625, %v2708_v4 }
  0xbc   : > { %4144 = vst [vmem:[#allocation16_spill] sm:$0xff] %v2822_v26 }
  0xbd   : > { %590 = vadd.xlane.f32.xlu2 %v589_v60  ;;  %4145 = vst [vmem:[#allocation17_spill] sm:$0xff] %v2855_v3 }
  0xbe   : > { %587 = vadd.xlane.f32.xlu1 %v586_v13 }
  0xbf   : > { %584 = vadd.xlane.f32.xlu0 %v583_v53 }
  0xc0   : > { %v2714_v9 = vpop.xlane.xlu2 %400 }
  0xc1   : > { %v2716_v46 = vpop.xlane.xlu1 %397 }
  0xc2   : > { %v2718_v47 = vpop.xlane.xlu0 %394  ;;  %v2873_v4 = vmul.f32 0.00390625, %v2716_v46 }
  0xc4   : > { %4147 = vst [vmem:[#allocation19_spill] sm:$0xff] %v2873_v4 }
  0xc7   : > { %593 = vadd.xlane.f32.xlu0 %v592_v48 }
  0xc8   : > { %v2720_v22 = vpop.xlane.xlu2 %409 }
  0xc9   : > { %v2722_v23 = vpop.xlane.xlu1 %406 }
  0xca   : > { %v2724_v15 = vpop.xlane.xlu0 %403 }
  0xd0   : > { %v2726_v1 = vpop.xlane.xlu2 %418 }
  0xd1   : > { %v2728_v16 = vpop.xlane.xlu1 %415 }
  0xd2   : > { %v2730_v10 = vpop.xlane.xlu0 %412 }
  0xd8   : > { %v2732_v55 = vpop.xlane.xlu2 %427 }
  0xd9   : > { %v2734_v56 = vpop.xlane.xlu1 %424 }
  0xda   : > { %v2736_v57 = vpop.xlane.xlu0 %421 }
  0xe0   : > { %v501_v44 = vpop.xlane.xlu2 %500 }
  0xe1   : > { %v2743_v32 = vpop.xlane.xlu1 %433  ;;  %v627_v43 = vmul.f32 0.00390625, %v501_v44 }
  0xe2   : > { %v2745_v51 = vpop.xlane.xlu0 %430 }
  0xe3   : > { %v691_v20 = vsub.f32 %v627_v43, %v659_v42  ;;  %v2848_v42 = vmul.f32 %v2812_v31, %v2812_v31  ;;  %v2852_v43 = vmul.f32 %v2815_v37, %v2815_v37 }
  0xe5   : > { %v723_v52 = vmax.f32 %v691_v20, 0.0 }
  0xe7   : > { %v2780_v34 = vadd.f32 1e-05, %v723_v52  ;;  %v2861_v52 = vmul.f32 %v2822_v26, %v2822_v26 }
  0xe8   : > { %v510_v28 = vpop.xlane.xlu2 %509 }
  0xe9   : > { %1998 = vrsqrt.f32 %v2780_v34  ;;  %v507_v30 = vpop.xlane.xlu1 %506  ;;  %v630_v49 = vmul.f32 0.00390625, %v510_v28  ;;  %vm793_vm1 = vweird.f32 %v2780_v34 }
  0xea   : > { %v504_v12 = vpop.xlane.xlu0 %503  ;;  %v629_v18 = vmul.f32 0.00390625, %v507_v30  ;;  %v2870_v30 = vmul.f32 0.00390625, %v2714_v9  ;;  %v2885_v9 = vmul.f32 0.00390625, %v2722_v23 }
  0xeb   : > { %v628_v25 = vmul.f32 0.00390625, %v504_v12  ;;  %v694_v60 = vsub.f32 %v630_v49, %v662_v45 }
  0xec   : > { %v693_v13 = vsub.f32 %v629_v18, %v661_v36  ;;  %4146 = vst [vmem:[#allocation18_spill] sm:$0xff] %v2870_v30 }
  0xed   : > { %v692_v53 = vsub.f32 %v628_v25, %v660_v17  ;;  %v726_v5 = vmax.f32 %v694_v60, 0.0  ;;  %v2877_v25 = vmul.f32 0.00390625, %v2718_v47  ;;  %v2880_v60 = vmul.f32 0.00390625, %v2720_v22  ;;  %4150 = vst [vmem:[#allocation22_spill] sm:$0xff] %v2885_v9 }
  0xee   : > { %v725_v61 = vmax.f32 %v693_v13, 0.0  ;;  %v2892_v47 = vmul.f32 0.00390625, %v2726_v1  ;;  %v2895_v22 = vmul.f32 0.00390625, %v2728_v16  ;;  %v2910_v1 = vmul.f32 %v2873_v4, %v2873_v4 }
  0xef   : > { %v724_v48 = vmax.f32 %v692_v53, 0.0  ;;  %v2844_v44 = vpop.eup %1998  ;;  %v2857_v20 = vadd.f32 1e-05, %v726_v5  ;;  %4148 = vst [vmem:[#allocation20_spill] sm:$0xff] %v2877_v25  ;;  %v2889_v5 = vmul.f32 0.00390625, %v2724_v15  ;;  %v2906_v15 = vmul.f32 %v2870_v30, %v2870_v30 }
  0xf0   : > { %v788_v36 = vmul.f32 %v2844_v44, %v2780_v34  ;;  %v2865_v45 = vadd.f32 1e-05, %v725_v61  ;;  %v519_v28 = vpop.xlane.xlu2 %518  ;;  %4149 = vst [vmem:[#allocation21_spill] sm:$0xff] %v2880_v60  ;;  %v2914_v16 = vmul.f32 %v2877_v25, %v2877_v25  ;;  %vm794_vm0 = vweird.f32 %v2844_v44 }
  0xf1   : > { %v2867_v17 = vadd.f32 1e-05, %v724_v48  ;;  %2000 = vrsqrt.f32 %v2857_v20  ;;  %v516_v49 = vpop.xlane.xlu1 %515  ;;  %v633_v12 = vmul.f32 0.00390625, %v519_v28  ;;  %4151 = vst [vmem:[#allocation23_spill] sm:$0xff] %v2889_v5  ;;  %v2899_v48 = vmul.f32 %v2855_v3, %v2855_v3  ;;  %vm795_vm2 = vmor %vm793_vm1, %vm794_vm0 }
  0xf2   : > { %v513_v18 = vpop.xlane.xlu0 %512  ;;  %v789_v13 = vmul.f32 %v2844_v44, %v788_v36  ;;  %2002 = vrsqrt.f32 %v2865_v45  ;;  %v632_v46 = vmul.f32 0.00390625, %v516_v49  ;;  %4152 = vst [vmem:[#allocation24_spill] sm:$0xff] %v2892_v47  ;;  %v2968_v3 = vmul.f32 0.00390625, %v2732_v55  ;;  %v1107_v55 = vld [vmem:[%s2960_s7] sm:$0xff] }
  0xf3   : > { %2004 = vrsqrt.f32 %v2867_v17  ;;  %v631_v53 = vmul.f32 0.00390625, %v513_v18  ;;  %4153 = vst [vmem:[#allocation25_spill] sm:$0xff] %v2895_v22  ;;  %v697_v36 = vsub.f32 %v633_v12, %v2819_v27  ;;  %v2987_v34 = vmul.f32 0.00390625, %v2736_v57 }
  0xf4   : > { %v790_v61 = vmul.f32 0.5, %v789_v13  ;;  %v696_v23 = vsub.f32 %v632_v46, %v2773_v14  ;;  %v2920_v14 = vmul.f32 %v2880_v60, %v2880_v60  ;;  %v2930_v46 = vmul.f32 %v2885_v9, %v2885_v9  ;;  %4155 = vst [vmem:[#allocation27_spill] sm:$0xff] %v2968_v3 }
  0xf5   : > { %v695_v28 = vsub.f32 %v631_v53, %v2767_v2  ;;  %v2923_v2 = vmul.f32 0.00390625, %v2730_v10  ;;  %v2934_v53 = vmul.f32 %v2889_v5, %v2889_v5  ;;  %v2942_v10 = vmul.f32 %v2895_v22, %v2895_v22  ;;  %4157 = vst [vmem:[#allocation29_spill] sm:$0xff] %v2987_v34 }
  0xf6   : > { %v791_v49 = vsub.f32 1.5, %v790_v61  ;;  %v728_v27 = vmax.f32 %v696_v23, 0.0  ;;  %v2938_v61 = vmul.f32 %v2892_v47, %v2892_v47  ;;  %v729_v37 = vmax.f32 %v697_v36, 0.0 }
  0xf7   : > { %v2916_v18 = vpop.eup %2000  ;;  %4154 = vst [vmem:[#allocation26_spill] sm:$0xff] %v2923_v2  ;;  %v727_v12 = vmax.f32 %v695_v28, 0.0  ;;  %v2965_v36 = vmul.f32 %v2923_v2, %v2923_v2  ;;  %vm813_vm4 = vweird.f32 %v2865_v45  ;;  %vm803_vm5 = vweird.f32 %v2867_v17 }
  0xf8   : > { %v2926_v13 = vpop.eup %2002  ;;  %v528_v23 = vpop.xlane.xlu2 %527  ;;  %v818_v30 = vmul.f32 %v2916_v18, %v2857_v20  ;;  %v792_v50 = vmul.f32 %v2844_v44, %v791_v49  ;;  %v2970_v4 = vadd.f32 1e-05, %v728_v27  ;;  %v2976_v31 = vadd.f32 1e-05, %v729_v37 }
  0xf9   : > { %v2944_v28 = vpop.eup %2004  ;;  %v808_v60 = vmul.f32 %v2926_v13, %v2865_v45  ;;  %v525_v5 = vpop.xlane.xlu1 %524  ;;  %v2953_v9 = vadd.f32 1e-05, %v727_v12  ;;  %v636_v12 = vmul.f32 0.00390625, %v528_v23  ;;  %v2984_v27 = vmul.f32 0.00390625, %v2734_v56 }
  0xfa   : > { %v522_v25 = vpop.xlane.xlu0 %521  ;;  %v798_v47 = vmul.f32 %v2944_v28, %v2867_v17  ;;  %v635_v22 = vmul.f32 0.00390625, %v525_v5  ;;  %v796_v37 = vsel %vm795_vm2, %v2844_v44, %v792_v50  ;;  %vm814_vm3 = vweird.f32 %v2926_v13  ;;  %v1108_v17 = vld [vmem:[%s2960_s7 + $0x8] sm:$0xff] }
  0xfb   : > { %v809_v5 = vmul.f32 %v2926_v13, %v808_v60  ;;  %2006 = vrsqrt.f32 %v2953_v9  ;;  %v700_v2 = vsub.f32 %v636_v12, %v2834_v38  ;;  %v634_v26 = vmul.f32 0.00390625, %v522_v25  ;;  %4156 = vst [vmem:[#allocation28_spill] sm:$0xff] %v2984_v27  ;;  %vm3040_vm7 = vmor %vm813_vm4, %vm814_vm3 }
  0xfc   : > { %v799_v62 = vmul.f32 %v2944_v28, %v798_v47  ;;  %v699_v49 = vsub.f32 %v635_v22, %v2786_v41  ;;  %v819_v60 = vmul.f32 %v2916_v18, %v818_v30  ;;  %2008 = vrsqrt.f32 %v2970_v4 }
  0xfd   : > { %v732_v47 = vmax.f32 %v700_v2, 0.0  ;;  %v698_v38 = vsub.f32 %v634_v26, %v2809_v63  ;;  %v2995_v25 = vmul.f32 %v2968_v3, %v2968_v3  ;;  %v810_v22 = vmul.f32 0.5, %v809_v5 }
  0xfe   : > { %v731_v41 = vmax.f32 %v699_v49, 0.0  ;;  %v800_v56 = vmul.f32 0.5, %v799_v62  ;;  %v2997_v23 = vmul.f32 %v1107_v55, %v796_v37  ;;  %2010 = vrsqrt.f32 %v2976_v31 }
  0xff   : > { %v3000_v30 = vadd.f32 1e-05, %v732_v47  ;;  %v730_v50 = vmax.f32 %v698_v38, 0.0  ;;  %v3006_v63 = vmul.f32 %v2984_v27, %v2984_v27  ;;  %v3010_v62 = vmul.f32 %v2987_v34, %v2987_v34 }
 0x100   : > { %v537_v57 = vpop.xlane.xlu2 %536  ;;  %v3012_v26 = vadd.f32 1e-05, %v731_v41  ;;  %1269 = vperm.xlu1 %1995, %v2997_v23   ;;  %v3016_v55 = vmul.f32 0.00390625, %v2743_v32  ;;  %v820_v37 = vmul.f32 0.5, %v819_v60  ;;  %v801_v3 = vsub.f32 1.5, %v800_v56 }
 0x101   : > { %v534_v44 = vpop.xlane.xlu1 %533  ;;  %v639_v12 = vmul.f32 0.00390625, %v537_v57  ;;  %v3002_v2 = vpop.eup %2006  ;;  %v811_v57 = vsub.f32 1.5, %v810_v22  ;;  %2012 = vrsqrt.f32 %v3000_v30  ;;  %v3021_v27 = vadd.f32 1e-05, %v730_v50 }
 0x102   : > { %v531_v49 = vpop.xlane.xlu0 %530  ;;  %v638_v5 = vmul.f32 0.00390625, %v534_v44  ;;  %4158 = vst [vmem:[#allocation30_spill] sm:$0xff] %v3016_v55  ;;  %v828_v47 = vmul.f32 %v3002_v2, %v2953_v9  ;;  %v3023_v34 = vpop.eup %2008  ;;  %2014 = vrsqrt.f32 %v3012_v26  ;;  %vm804_vm6 = vweird.f32 %v2944_v28 }
 0x103   : > { %v637_v38 = vmul.f32 0.00390625, %v531_v49  ;;  %v703_v32 = vsub.f32 %v639_v12, %v2848_v42  ;;  %v838_v42 = vmul.f32 %v3023_v34, %v2970_v4  ;;  %2016 = vrsqrt.f32 %v3021_v27  ;;  %vm3059_vm8 = vmor %vm803_vm5, %vm804_vm6 }
 0x104   : > { %v829_v41 = vmul.f32 %v3002_v2, %v828_v47  ;;  %v702_v44 = vsub.f32 %v638_v5, %v2826_v58  ;;  %v3033_v60 = vpop.eup %2010  ;;  %v812_v45 = vmul.f32 %v2926_v13, %v811_v57  ;;  %v802_v49 = vmul.f32 %v2944_v28, %v801_v3 }
 0x105   : > { %v735_v50 = vmax.f32 %v703_v32, 0.0  ;;  %v701_v58 = vsub.f32 %v637_v38, %v2830_v40  ;;  %v3047_v47 = vmul.f32 %v3016_v55, %v3016_v55  ;;  %v3050_v40 = vmul.f32 0.00390625, %v2745_v51 }
 0x106   : > { %v830_v22 = vmul.f32 0.5, %v829_v41  ;;  %v734_v56 = vmax.f32 %v702_v44, 0.0  ;;  %v821_v38 = vsub.f32 1.5, %v820_v37  ;;  %v1109_v44 = vld [vmem:[%s2960_s7 + $0x10] sm:$0xff]  ;;  %v848_v51 = vmul.f32 %v3033_v60, %v2976_v31 }
 0x107   : > { %4161 = vst [vmem:[#allocation31_spill] sm:$0xff] %v3050_v40  ;;  %v3052_v41 = vadd.f32 1e-05, %v735_v50  ;;  %v3063_v35 = vpop.eup %2012  ;;  %v816_v37 = vsel %vm3040_vm7, %v2926_v13, %v812_v45  ;;  %v806_v50 = vsel %vm3059_vm8, %v2944_v28, %v802_v49  ;;  %v733_v24 = vmax.f32 %v701_v58, 0.0 }
 0x108   : > { %v546_v5 = vpop.xlane.xlu2 %545  ;;  %v831_v54 = vsub.f32 1.5, %v830_v22  ;;  %v878_v0 = vmul.f32 %v3063_v35, %v3000_v30  ;;  %v3076_v11 = vadd.f32 1e-05, %v734_v56  ;;  %v3078_v29 = vpop.eup %2014  ;;  %vm823_vm9 = vweird.f32 %v2857_v20  ;;  %v1111_v20 = vld [vmem:[%s2960_s7 + $0x20] sm:$0xff] }
 0x109   : > { %v543_v3 = vpop.xlane.xlu1 %542  ;;  %v642_v55 = vmul.f32 0.00390625, %v546_v5  ;;  %v839_v12 = vmul.f32 %v3023_v34, %v838_v42  ;;  %2018 = vrsqrt.f32 %v3052_v41  ;;  %v3083_v13 = vmul.f32 %v1109_v44, %v816_v37  ;;  %v3090_v56 = vpop.eup %2016 }
 0x10a   : > { %v540_v32 = vpop.xlane.xlu0 %539  ;;  %vm833_vm10 = vweird.f32 %v2953_v9  ;;  %v879_v28 = vmul.f32 %v3063_v35, %v878_v0  ;;  %v3087_v22 = vmul.f32 %v1108_v17, %v806_v50  ;;  %vm824_vm11 = vweird.f32 %v2916_v18 }
 0x10b   : > { %4164 = vst [vmem:[#allocation32_spill] sm:$0xff] %v3083_v13  ;;  %1279 = vperm.xlu0 %1997, %v3083_v13   ;;  %v641_v58 = vmul.f32 0.00390625, %v543_v3  ;;  %v706_v45 = vsub.f32 %v642_v55, %v2899_v48  ;;  %v640_v42 = vmul.f32 0.00390625, %v540_v32  ;;  %v822_v49 = vmul.f32 %v2916_v18, %v821_v38  ;;  %vm3111_vm12 = vmor %vm823_vm9, %vm824_vm11 }
 0x10c   : > { %v849_v5 = vmul.f32 %v3033_v60, %v848_v51  ;;  %2020 = vrsqrt.f32 %v3076_v11  ;;  %v3097_v44 = vadd.f32 1e-05, %v733_v24  ;;  %1274 = vperm.xlu2 %1996, %v3087_v22   ;;  %v832_v0 = vmul.f32 %v3002_v2, %v831_v54 }
 0x10d   : > { %v840_v57 = vmul.f32 0.5, %v839_v12  ;;  %v705_v37 = vsub.f32 %v641_v58, %v2838_v59  ;;  %v738_v3 = vmax.f32 %v706_v45, 0.0  ;;  %v704_v48 = vsub.f32 %v640_v42, %v2842_v39  ;;  %v1110_v12 = vld [vmem:[%s2960_s7 + $0x18] sm:$0xff] }
 0x10e   : > { %v868_v55 = vmul.f32 %v3078_v29, %v3012_v26  ;;  %v880_v38 = vmul.f32 0.5, %v879_v28  ;;  %v858_v24 = vmul.f32 %v3090_v56, %v3021_v27  ;;  %vm834_vm13 = vweird.f32 %v3002_v2 }
 0x10f   : > { %v3116_v32 = vpop.eup %2018  ;;  %v737_v39 = vmax.f32 %v705_v37, 0.0  ;;  %v3118_v51 = vadd.f32 1e-05, %v738_v3  ;;  %v736_v50 = vmax.f32 %v704_v48, 0.0  ;;  %v826_v17 = vsel %vm3111_vm12, %v2916_v18, %v822_v49  ;;  %vm835_vm14 = vmor %vm833_vm10, %vm834_vm13 }
 0x110   : > { %v908_v28 = vmul.f32 %v3116_v32, %v3052_v41  ;;  %2022 = vrsqrt.f32 %v3097_v44  ;;  %v836_v58 = vsel %vm835_vm14, %v3002_v2, %v832_v0  ;;  %v3133_v37 = vmul.f32 %v3050_v40, %v3050_v40  ;;  %v555_v2 = vpop.xlane.xlu2 %554 }
 0x111   : > { %v552_v59 = vpop.xlane.xlu1 %551  ;;  %v850_v3 = vmul.f32 0.5, %v849_v5  ;;  %v3135_v18 = vadd.f32 1e-05, %v737_v39  ;;  %2024 = vrsqrt.f32 %v3118_v51  ;;  %v881_v49 = vsub.f32 1.5, %v880_v38 }
 0x112   : > { %v644_v45 = vmul.f32 0.00390625, %v552_v59  ;;  %v549_v42 = vpop.xlane.xlu0 %548  ;;  %v3138_v9 = vpop.eup %2020  ;;  %v3140_v48 = vadd.f32 1e-05, %v736_v50  ;;  %v3142_v54 = vmul.f32 %v1110_v12, %v826_v17  ;;  %v3144_v13 = vmul.f32 %v1111_v20, %v836_v58 }
 0x113   : > { %v841_v0 = vsub.f32 1.5, %v840_v57  ;;  %vm843_vm15 = vweird.f32 %v2970_v4  ;;  %v869_v59 = vmul.f32 %v3078_v29, %v868_v55  ;;  %vm883_vm0 = vweird.f32 %v3000_v30 }
 0x114   : > { %vm853_vm1 = vweird.f32 %v2976_v31  ;;  %v859_v5 = vmul.f32 %v3090_v56, %v858_v24  ;;  %v909_v38 = vmul.f32 %v3116_v32, %v908_v28  ;;  %2026 = vrsqrt.f32 %v3135_v18  ;;  %1284 = vperm.xlu2 %1996, %v3142_v54   ;;  %1289 = vperm.xlu1 %1995, %v3144_v13   ;;  %v1116_v28 = vld [vmem:[%s2960_s7 + $0x48] sm:$0xff] }
 0x115   : > { %v708_v57 = vsub.f32 %v644_v45, %v2852_v43  ;;  %v851_v39 = vsub.f32 1.5, %v850_v3  ;;  %v898_v55 = vmul.f32 %v3138_v9, %v3076_v11  ;;  %v645_v50 = vmul.f32 0.00390625, %v555_v2 }
 0x116   : > { %v643_v17 = vmul.f32 0.00390625, %v549_v42  ;;  %v3158_v12 = vpop.eup %2022  ;;  %2028 = vrsqrt.f32 %v3140_v48  ;;  %v882_v20 = vmul.f32 %v3063_v35, %v881_v49  ;;  %vm884_vm2 = vweird.f32 %v3063_v35 }
 0x117   : > { %v740_v24 = vmax.f32 %v708_v57, 0.0  ;;  %v3164_v58 = vpop.eup %2024  ;;  %v3166_v43 = vmul.f32 0.5, %v869_v59  ;;  %v709_v45 = vsub.f32 %v645_v50, %v2914_v16  ;;  %vm885_vm3 = vmor %vm883_vm0, %vm884_vm2  ;;  %v842_v42 = vmul.f32 %v3023_v34, %v841_v0 }
 0x118   : > { %v707_v3 = vsub.f32 %v643_v17, %v2861_v52  ;;  %v3173_v2 = vmul.f32 0.5, %v859_v5  ;;  %v910_v49 = vmul.f32 0.5, %v909_v38  ;;  %v886_v57 = vsel %vm885_vm3, %v3063_v35, %v882_v20  ;;  %v1112_v52 = vld [vmem:[%s2960_s7 + $0x28] sm:$0xff] }
 0x119   : > { %vm844_vm4 = vweird.f32 %v3023_v34  ;;  %v888_v59 = vmul.f32 %v3158_v12, %v3097_v44  ;;  %v741_v40 = vmax.f32 %v709_v45, 0.0  ;;  %v3179_v16 = vmul.f32 %v1116_v28, %v886_v57 }
 0x11a   : > { %v739_v8 = vmax.f32 %v707_v3, 0.0  ;;  %v3182_v50 = vpop.eup %2026  ;;  %vm873_vm5 = vweird.f32 %v3012_v26  ;;  %v899_v30 = vmul.f32 %v3138_v9, %v898_v55  ;;  %v938_v35 = vmul.f32 %v3164_v58, %v3118_v51  ;;  %vm845_vm6 = vmor %vm843_vm15, %vm844_vm4  ;;  %v558_v38 = vpop.xlane.xlu0 %557 }
 0x11b   : > { %4167 = vst [vmem:[#allocation33_spill] sm:$0xff] %v3179_v16  ;;  %v3188_v0 = vadd.f32 1e-05, %v740_v24  ;;  %v852_v5 = vmul.f32 %v3033_v60, %v851_v39  ;;  %v871_v17 = vsub.f32 1.5, %v3166_v43  ;;  %vm913_vm7 = vweird.f32 %v3052_v41  ;;  %1314 = vperm.xlu0 %1997, %v3179_v16   ;;  %v1113_v39 = vld [vmem:[%s2960_s7 + $0x30] sm:$0xff]  ;;  %v561_v3 = vpop.xlane.xlu1 %560  ;;  %v564_v43 = vpop.xlane.xlu2 %563 }
 0x11c   : > { %v3195_v20 = vadd.f32 1e-05, %v741_v40  ;;  %v846_v55 = vsel %vm845_vm6, %v3023_v34, %v842_v42  ;;  %v3199_v28 = vpop.eup %2028  ;;  %v911_v24 = vsub.f32 1.5, %v910_v49  ;;  %v3201_v45 = vadd.f32 1e-05, %v739_v8 }
 0x11d   : > { %v3203_v4 = vmul.f32 %v1112_v52, %v846_v55  ;;  %vm854_vm8 = vweird.f32 %v3033_v60  ;;  %v861_v57 = vsub.f32 1.5, %v3173_v2  ;;  %v889_v40 = vmul.f32 %v3158_v12, %v888_v59 }
 0x11e   : > { %v928_v16 = vmul.f32 %v3182_v50, %v3135_v18  ;;  %2030 = vrsqrt.f32 %v3195_v20  ;;  %vm855_vm9 = vmor %vm853_vm1, %vm854_vm8  ;;  %v3214_v8 = vmul.f32 0.5, %v899_v30  ;;  %v939_v34 = vmul.f32 %v3164_v58, %v938_v35  ;;  %v1119_v35 = vld [vmem:[%s2960_s7 + $0x60] sm:$0xff] }
 0x11f   : > { %2032 = vrsqrt.f32 %v3188_v0  ;;  %1294 = vperm.xlu2 %1996, %v3203_v4   ;;  %v856_v42 = vsel %vm855_vm9, %v3033_v60, %v852_v5  ;;  %vm863_vm10 = vweird.f32 %v3021_v27  ;;  %v918_v2 = vmul.f32 %v3199_v28, %v3140_v48 }
 0x120   : > { %v3223_v49 = vmul.f32 %v1113_v39, %v856_v42  ;;  %v647_v31 = vmul.f32 0.00390625, %v561_v3  ;;  %v648_v59 = vmul.f32 0.00390625, %v564_v43  ;;  %2034 = vrsqrt.f32 %v3201_v45 }
 0x121   : > { %v646_v52 = vmul.f32 0.00390625, %v558_v38  ;;  %v912_v30 = vmul.f32 %v3116_v32, %v911_v24  ;;  %vm914_vm11 = vweird.f32 %v3116_v32  ;;  %v3229_v55 = vmul.f32 0.5, %v889_v40 }
 0x122   : > { %v929_v60 = vmul.f32 %v3182_v50, %v928_v16  ;;  %1299 = vperm.xlu1 %1995, %v3223_v49   ;;  %v711_v5 = vsub.f32 %v647_v31, %v2906_v15  ;;  %v712_v39 = vsub.f32 %v648_v59, %v2934_v53  ;;  %vm915_vm12 = vmor %vm913_vm7, %vm914_vm11  ;;  %v872_v3 = vmul.f32 %v3078_v29, %v871_v17  ;;  %v1115_v31 = vld [vmem:[%s2960_s7 + $0x40] sm:$0xff]  ;;  %v567_v59 = vpop.xlane.xlu0 %566 }
 0x123   : > { %v710_v38 = vsub.f32 %v646_v52, %v2910_v1  ;;  %v916_v24 = vsel %vm915_vm12, %v3116_v32, %v912_v30  ;;  %vm874_vm13 = vweird.f32 %v3078_v29  ;;  %v940_v16 = vmul.f32 0.5, %v939_v34 }
 0x124   : > { %v3241_v43 = vpop.eup %2030  ;;  %v743_v40 = vmax.f32 %v711_v5, 0.0  ;;  %v744_v42 = vmax.f32 %v712_v39, 0.0  ;;  %v3243_v15 = vmul.f32 %v1119_v35, %v916_v24  ;;  %vm3247_vm14 = vmor %vm873_vm5, %vm874_vm13  ;;  %v919_v41 = vmul.f32 %v3199_v28, %v918_v2  ;;  %v570_v5 = vpop.xlane.xlu1 %569 }
 0x125   : > { %v3251_v1 = vpop.eup %2032  ;;  %v968_v32 = vmul.f32 %v3241_v43, %v3195_v20  ;;  %v742_v17 = vmax.f32 %v710_v38, 0.0  ;;  %v876_v34 = vsel %vm3247_vm14, %v3078_v29, %v872_v3  ;;  %vm903_vm15 = vweird.f32 %v3076_v11  ;;  %v573_v3 = vpop.xlane.xlu2 %572 }
 0x126   : > { %4168 = vst [vmem:[#allocation34_spill] sm:$0xff] %v3243_v15  ;;  %v3261_v26 = vadd.f32 1e-05, %v743_v40  ;;  %v3263_v52 = vadd.f32 1e-05, %v744_v42  ;;  %1329 = vperm.xlu0 %1997, %v3243_v15   ;;  %v862_v2 = vmul.f32 %v3090_v56, %v861_v57  ;;  %v3267_v30 = vpop.eup %2034  ;;  %v901_v35 = vsub.f32 1.5, %v3214_v8 }
 0x127   : > { %vm893_vm0 = vweird.f32 %v3097_v44  ;;  %vm943_vm1 = vweird.f32 %v3118_v51  ;;  %v969_v29 = vmul.f32 %v3241_v43, %v968_v32  ;;  %vm864_vm2 = vweird.f32 %v3090_v56  ;;  %v1114_v57 = vld [vmem:[%s2960_s7 + $0x38] sm:$0xff] }
 0x128   : > { %v941_v39 = vsub.f32 1.5, %v940_v16  ;;  %2036 = vrsqrt.f32 %v3261_v26  ;;  %v3275_v38 = vadd.f32 1e-05, %v742_v17  ;;  %v3277_v24 = vmul.f32 %v1115_v31, %v876_v34  ;;  %vm865_vm3 = vmor %vm863_vm10, %vm864_vm2  ;;  %v1122_v15 = vld [vmem:[%s2960_s7 + $0x78] sm:$0xff] }
 0x129   : > { %v891_v8 = vsub.f32 1.5, %v3229_v55  ;;  %v3281_v40 = vmul.f32 0.5, %v929_v60  ;;  %v3283_v42 = vmul.f32 0.5, %v919_v41  ;;  %2038 = vrsqrt.f32 %v3263_v52 }
 0x12a   : > { %v958_v16 = vmul.f32 %v3251_v1, %v3188_v0  ;;  %v948_v53 = vmul.f32 %v3267_v30, %v3201_v45  ;;  %1309 = vperm.xlu1 %1995, %v3277_v24   ;;  %v866_v55 = vsel %vm865_vm3, %v3090_v56, %v862_v2  ;;  %v650_v60 = vmul.f32 0.00390625, %v570_v5 }
 0x12b   : > { %v3294_v32 = vmul.f32 0.5, %v969_v29  ;;  %v3296_v41 = vmul.f32 %v1114_v57, %v866_v55  ;;  %v651_v17 = vmul.f32 0.00390625, %v573_v3  ;;  %v649_v34 = vmul.f32 0.00390625, %v567_v59 }
 0x12c   : > { %2040 = vrsqrt.f32 %v3275_v38  ;;  %v714_v27 = vsub.f32 %v650_v60, %v2920_v14  ;;  %v942_v31 = vmul.f32 %v3164_v58, %v941_v39  ;;  %vm944_vm4 = vweird.f32 %v3164_v58 }
 0x12d   : > { %1304 = vperm.xlu2 %1996, %v3296_v41   ;;  %v715_v56 = vsub.f32 %v651_v17, %v2965_v36  ;;  %v713_v2 = vsub.f32 %v649_v34, %v2930_v46  ;;  %vm945_vm5 = vmor %vm943_vm1, %vm944_vm4  ;;  %v902_v59 = vmul.f32 %v3138_v9, %v901_v35  ;;  %vm904_vm6 = vweird.f32 %v3138_v9 }
 0x12e   : > { %v3310_v14 = vpop.eup %2036  ;;  %v746_v29 = vmax.f32 %v714_v27, 0.0  ;;  %v946_v5 = vsel %vm945_vm5, %v3164_v58, %v942_v31  ;;  %v892_v39 = vmul.f32 %v3158_v12, %v891_v8  ;;  %vm894_vm7 = vweird.f32 %v3158_v12  ;;  %vm3323_vm8 = vmor %vm903_vm15, %vm904_vm6  ;;  %v1118_v58 = vld [vmem:[%s2960_s7 + $0x58] sm:$0xff]  ;;  %v576_v8 = vpop.xlane.xlu0 %575 }
 0x12f   : > { %v3315_v36 = vpop.eup %2038  ;;  %v988_v46 = vmul.f32 %v3310_v14, %v3261_v26  ;;  %v747_v51 = vmax.f32 %v715_v56, 0.0  ;;  %v745_v57 = vmax.f32 %v713_v2, 0.0  ;;  %v3319_v35 = vmul.f32 %v1122_v15, %v946_v5  ;;  %vm3339_vm10 = vmor %vm893_vm0, %vm894_vm7  ;;  %v1117_v56 = vld [vmem:[%s2960_s7 + $0x50] sm:$0xff] }
 0x130   : > { %vm933_vm9 = vweird.f32 %v3135_v18  ;;  %v959_v55 = vmul.f32 %v3251_v1, %v958_v16  ;;  %v998_v60 = vmul.f32 %v3315_v36, %v3263_v52  ;;  %v3332_v17 = vadd.f32 1e-05, %v746_v29  ;;  %v582_v29 = vpop.xlane.xlu2 %581 }
 0x131   : > { %v906_v15 = vsel %vm3323_vm8, %v3138_v9, %v902_v59  ;;  %v949_v34 = vmul.f32 %v3267_v30, %v948_v53  ;;  %v3344_v27 = vadd.f32 1e-05, %v747_v51  ;;  %v3346_v16 = vadd.f32 1e-05, %v745_v57  ;;  %1344 = vperm.xlu0 %1997, %v3319_v35   ;;  %v579_v59 = vpop.xlane.xlu1 %578 }
 0x132   : > { %v896_v31 = vsel %vm3339_vm10, %v3158_v12, %v892_v39  ;;  %v3353_v9 = vpop.eup %2040  ;;  %vm923_vm11 = vweird.f32 %v3140_v48  ;;  %v971_v44 = vsub.f32 1.5, %v3294_v32  ;;  %v989_v2 = vmul.f32 %v3310_v14, %v988_v46 }
 0x133   : > { %2042 = vrsqrt.f32 %v3332_v17  ;;  %v3359_v53 = vmul.f32 %v1118_v58, %v906_v15  ;;  %v931_v5 = vsub.f32 1.5, %v3281_v40  ;;  %vm973_vm12 = vweird.f32 %v3195_v20 }
 0x134   : > { %v999_v12 = vmul.f32 %v3315_v36, %v998_v60  ;;  %2044 = vrsqrt.f32 %v3344_v27  ;;  %v921_v39 = vsub.f32 1.5, %v3283_v42  ;;  %v3366_v32 = vmul.f32 0.5, %v959_v55  ;;  %v1125_v60 = vld [vmem:[%s2960_s7 + $0x90] sm:$0xff] }
 0x135   : > { %2046 = vrsqrt.f32 %v3346_v16  ;;  %1324 = vperm.xlu1 %1995, %v3359_v53   ;;  %v3370_v46 = vmul.f32 %v1117_v56, %v896_v31  ;;  %v3372_v51 = vmul.f32 0.5, %v949_v34  ;;  %v978_v40 = vmul.f32 %v3353_v9, %v3275_v38 }
 0x136   : > { %v653_v57 = vmul.f32 0.00390625, %v579_v59  ;;  %v654_v3 = vmul.f32 0.00390625, %v582_v29  ;;  %v3376_v58 = vmul.f32 0.5, %v989_v2  ;;  %v652_v42 = vmul.f32 0.00390625, %v576_v8 }
 0x137   : > { %1319 = vperm.xlu2 %1996, %v3370_v46   ;;  %v972_v55 = vmul.f32 %v3241_v43, %v971_v44  ;;  %vm974_vm13 = vweird.f32 %v3241_v43  ;;  %v1000_v15 = vmul.f32 0.5, %v999_v12  ;;  %v932_v31 = vmul.f32 %v3182_v50, %v931_v5 }
 0x138   : > { %v717_v11 = vsub.f32 %v653_v57, %v2938_v61  ;;  %v718_v34 = vsub.f32 %v654_v3, %v3010_v62  ;;  %vm975_vm14 = vmor %vm973_vm12, %vm974_vm13  ;;  %v716_v8 = vsub.f32 %v652_v42, %v2942_v10  ;;  %vm934_vm15 = vweird.f32 %v3182_v50  ;;  %v1121_v10 = vld [vmem:[%s2960_s7 + $0x70] sm:$0xff]  ;;  %v591_v5 = vpop.xlane.xlu2 %590 }
 0x139   : > { %v3387_v56 = vpop.eup %2042  ;;  %v976_v44 = vsel %vm975_vm14, %v3241_v43, %v972_v55  ;;  %v922_v2 = vmul.f32 %v3199_v28, %v921_v39  ;;  %vm3401_vm0 = vmor %vm933_vm9, %vm934_vm15  ;;  %v585_v43 = vpop.xlane.xlu0 %584  ;;  %vm963_vm1 = vweird.f32 %v3188_v0  ;;  %vm924_vm2 = vweird.f32 %v3199_v28 }
 0x13a   : > { %v3393_v59 = vpop.eup %2044  ;;  %v1018_v61 = vmul.f32 %v3387_v56, %v3332_v17  ;;  %v749_v62 = vmax.f32 %v717_v11, 0.0  ;;  %v750_v20 = vmax.f32 %v718_v34, 0.0  ;;  %v3397_v29 = vmul.f32 %v1125_v60, %v976_v44  ;;  %vm3426_vm4 = vmor %vm923_vm11, %vm924_vm2 }
 0x13b   : > { %v3406_v12 = vpop.eup %2046  ;;  %v1028_v39 = vmul.f32 %v3393_v59, %v3344_v27  ;;  %v748_v57 = vmax.f32 %v716_v8, 0.0  ;;  %v936_v3 = vsel %vm3401_vm0, %v3182_v50, %v932_v31  ;;  %vm953_vm3 = vweird.f32 %v3201_v45  ;;  %v1120_v8 = vld [vmem:[%s2960_s7 + $0x68] sm:$0xff] }
 0x13c   : > { %v979_v18 = vmul.f32 %v3353_v9, %v978_v40  ;;  %v1008_v42 = vmul.f32 %v3406_v12, %v3346_v16  ;;  %v3419_v55 = vadd.f32 1e-05, %v749_v62  ;;  %v3421_v60 = vadd.f32 1e-05, %v750_v20  ;;  %1359 = vperm.xlu0 %1997, %v3397_v29   ;;  %v588_v20 = vpop.xlane.xlu1 %587 }
 0x13d   : > { %v1029_v50 = vmul.f32 %v3393_v59, %v1028_v39  ;;  %v3431_v34 = vadd.f32 1e-05, %v748_v57  ;;  %v3433_v40 = vmul.f32 %v1121_v10, %v936_v3  ;;  %v926_v31 = vsel %vm3426_vm4, %v3199_v28, %v922_v2 }
 0x13e   : > { %v961_v44 = vsub.f32 1.5, %v3366_v32  ;;  %v1001_v62 = vsub.f32 1.5, %v1000_v15  ;;  %v1019_v48 = vmul.f32 %v3387_v56, %v1018_v61  ;;  %2048 = vrsqrt.f32 %v3419_v55 }
 0x13f   : > { %v951_v39 = vsub.f32 1.5, %v3372_v51  ;;  %vm1003_vm5 = vweird.f32 %v3263_v52  ;;  %2050 = vrsqrt.f32 %v3421_v60  ;;  %1339 = vperm.xlu1 %1995, %v3433_v40   ;;  %v3447_v28 = vmul.f32 0.5, %v979_v18 }
 0x140   : > { %v1009_v32 = vmul.f32 %v3406_v12, %v1008_v42  ;;  %2052 = vrsqrt.f32 %v3431_v34  ;;  %v3451_v15 = vmul.f32 %v1120_v8, %v926_v31  ;;  %v1030_v2 = vmul.f32 0.5, %v1029_v50  ;;  %v1128_v50 = vld [vmem:[%s2960_s7 + $0xa8] sm:$0xff] }
 0x141   : > { %v656_v61 = vmul.f32 0.00390625, %v588_v20  ;;  %v657_v51 = vmul.f32 0.00390625, %v591_v5  ;;  %v655_v10 = vmul.f32 0.00390625, %v585_v43  ;;  %v3453_v3 = vmul.f32 0.5, %v1019_v48  ;;  %v594_v52 = vpop.xlane.xlu0 %593 }
 0x142   : > { %1334 = vperm.xlu2 %1996, %v3451_v15   ;;  %v1002_v11 = vmul.f32 %v3315_v36, %v1001_v62  ;;  %vm1004_vm6 = vweird.f32 %v3315_v36  ;;  %v962_v18 = vmul.f32 %v3251_v1, %v961_v44  ;;  %vm964_vm8 = vweird.f32 %v3251_v1 }
 0x143   : > { %v720_v42 = vsub.f32 %v656_v61, %v2995_v25  ;;  %v721_v57 = vsub.f32 %v657_v51, %v3133_v37  ;;  %v719_v31 = vsub.f32 %v655_v10, %v3006_v63  ;;  %vm3464_vm7 = vmor %vm1003_vm5, %vm1004_vm6  ;;  %v3472_v44 = vmul.f32 0.5, %v1009_v32  ;;  %v1123_v61 = vld [vmem:[%s2960_s7 + $0x80] sm:$0xff] }
 0x144   : > { %v3470_v8 = vpop.eup %2048  ;;  %v1006_v25 = vsel %vm3464_vm7, %v3315_v36, %v1002_v11  ;;  %vm3479_vm9 = vmor %vm963_vm1, %vm964_vm8  ;;  %v952_v37 = vmul.f32 %v3267_v30, %v951_v39  ;;  %vm954_vm10 = vweird.f32 %v3267_v30  ;;  %vm993_vm11 = vweird.f32 %v3261_v26  ;;  %v1124_v36 = vld [vmem:[%s2960_s7 + $0x88] sm:$0xff] }
 0x145   : > { %v3485_v62 = vpop.eup %2050  ;;  %v1031_v48 = vsub.f32 1.5, %v1030_v2  ;;  %v752_v20 = vmax.f32 %v720_v42, 0.0  ;;  %v753_v5 = vmax.f32 %v721_v57, 0.0  ;;  %v751_v32 = vmax.f32 %v719_v31, 0.0  ;;  %vm3491_vm12 = vmor %vm953_vm3, %vm954_vm10 }
 0x146   : > { %v3496_v39 = vpop.eup %2052  ;;  %vm983_vm13 = vweird.f32 %v3275_v38  ;;  %v1058_v51 = vmul.f32 %v3485_v62, %v3421_v60  ;;  %v3501_v10 = vmul.f32 %v1128_v50, %v1006_v25  ;;  %v966_v57 = vsel %vm3479_vm9, %v3251_v1, %v962_v18 }
 0x147   : > { %v956_v45 = vsel %vm3491_vm12, %v3267_v30, %v952_v37  ;;  %v1048_v2 = vmul.f32 %v3470_v8, %v3419_v55  ;;  %v3511_v11 = vadd.f32 1e-05, %v752_v20  ;;  %v3513_v42 = vadd.f32 1e-05, %v753_v5 }
 0x148   : > { %v658_v31 = vmul.f32 0.00390625, %v594_v52  ;;  %v1059_v43 = vmul.f32 %v3485_v62, %v1058_v51  ;;  %v3516_v50 = vadd.f32 1e-05, %v751_v32  ;;  %1374 = vperm.xlu0 %1997, %v3501_v10   ;;  %v3519_v25 = vmul.f32 %v1124_v36, %v966_v57  ;;  %v1131_v32 = vld [vmem:[%s2960_s7 + $0xc0] sm:$0xff] }
 0x149   : > { %v3521_v1 = vmul.f32 %v1123_v61, %v956_v45  ;;  %v981_v30 = vsub.f32 1.5, %v3447_v28  ;;  %vm1033_vm14 = vweird.f32 %v3344_v27  ;;  %v1038_v18 = vmul.f32 %v3496_v39, %v3431_v34  ;;  %v1127_v51 = vld [vmem:[%s2960_s7 + $0xa0] sm:$0xff] }
 0x14a   : > { %2054 = vrsqrt.f32 %v3511_v11  ;;  %v1021_v63 = vsub.f32 1.5, %v3453_v3  ;;  %v1060_v37 = vmul.f32 0.5, %v1059_v43  ;;  %vm1063_vm15 = vweird.f32 %v3421_v60  ;;  %1354 = vperm.xlu1 %1995, %v3519_v25  }
 0x14b   : > { %2056 = vrsqrt.f32 %v3513_v42  ;;  %1349 = vperm.xlu2 %1996, %v3521_v1   ;;  %v1011_v28 = vsub.f32 1.5, %v3472_v44  ;;  %v1049_v52 = vmul.f32 %v3470_v8, %v1048_v2  ;;  %v722_v20 = vsub.f32 %v658_v31, %v3047_v47 }
 0x14c   : > { %2058 = vrsqrt.f32 %v3516_v50  ;;  %v1061_v3 = vsub.f32 1.5, %v1060_v37  ;;  %v1032_v5 = vmul.f32 %v3393_v59, %v1031_v48  ;;  %vm1034_vm0 = vweird.f32 %v3393_v59 }
 0x14d   : > { %v4185_v36 = vsub.f32 1.5, %v3376_v58  ;;  %v1039_v61 = vmul.f32 %v3496_v39, %v1038_v18  ;;  %v754_v44 = vmax.f32 %v722_v20, 0.0  ;;  %vm1035_vm1 = vmor %vm1033_vm14, %vm1034_vm0  ;;  %vm994_vm2 = vweird.f32 %v3310_v14  ;;  %v1126_v58 = vld [vmem:[%s2960_s7 + $0x98] sm:$0xff] }
 0x14e   : > { %v982_v47 = vmul.f32 %v3353_v9, %v981_v30  ;;  %v1036_v48 = vsel %vm1035_vm1, %v3393_v59, %v1032_v5  ;;  %vm995_vm3 = vmor %vm993_vm11, %vm994_vm2  ;;  %vm984_vm4 = vweird.f32 %v3353_v9  ;;  %v1062_v57 = vmul.f32 %v3485_v62, %v1061_v3  ;;  %v1134_v5 = vld [vmem:[%s2960_s7 + $0xd8] sm:$0xff] }
 0x14f   : > { %v992_v0 = vmul.f32 %v3310_v14, %v4185_v36  ;;  %vm1064_vm5 = vweird.f32 %v3485_v62  ;;  %v1050_v27 = vmul.f32 0.5, %v1049_v52  ;;  %v3558_v2 = vadd.f32 1e-05, %v754_v44  ;;  %vm985_vm6 = vmor %vm983_vm13, %vm984_vm4 }
 0x150   : > { %v3556_v45 = vpop.eup %2054  ;;  %v3560_v31 = vmul.f32 %v1131_v32, %v1036_v48  ;;  %v986_v18 = vsel %vm985_vm6, %v3353_v9, %v982_v47  ;;  %v1022_v37 = vmul.f32 %v3387_v56, %v1021_v63  ;;  %vm3582_vm7 = vmor %vm1063_vm15, %vm1064_vm5  ;;  %vm1024_vm8 = vweird.f32 %v3387_v56  ;;  %v1129_v48 = vld [vmem:[%s2960_s7 + $0xb0] sm:$0xff] }
 0x151   : > { %v996_v43 = vsel %vm995_vm3, %v3310_v14, %v992_v0  ;;  %v2057_v26 = vpop.eup %2056  ;;  %v1078_v59 = vmul.f32 %v3556_v45, %v3511_v11  ;;  %2060 = vrsqrt.f32 %v3558_v2  ;;  %v3576_v38 = vmul.f32 %v1126_v58, %v986_v18 }
 0x152   : > { %v3567_v30 = vmul.f32 %v1127_v51, %v996_v43  ;;  %v3571_v52 = vpop.eup %2058  ;;  %v1088_v20 = vmul.f32 %v2057_v26, %v3513_v42  ;;  %1389 = vperm.xlu0 %1997, %v3560_v31   ;;  %v1040_v9 = vmul.f32 0.5, %v1039_v61  ;;  %v1066_v3 = vsel %vm3582_vm7, %v3485_v62, %v1062_v57  ;;  %v1130_v51 = vld [vmem:[%s2960_s7 + $0xb8] sm:$0xff] }
 0x153   : > { %v1068_v63 = vmul.f32 %v3571_v52, %v3516_v50  ;;  %vm1023_vm9 = vweird.f32 %v3332_v17  ;;  %1364 = vperm.xlu2 %1996, %v3576_v38   ;;  %v1012_v32 = vmul.f32 %v3406_v12, %v1011_v28  ;;  %vm1013_vm10 = vweird.f32 %v3346_v16 }
 0x154   : > { %1369 = vperm.xlu1 %1995, %v3567_v30   ;;  %v1089_v60 = vmul.f32 %v2057_v26, %v1088_v20  ;;  %v1079_v36 = vmul.f32 %v3556_v45, %v1078_v59  ;;  %vm3599_vm11 = vmor %vm1023_vm9, %vm1024_vm8  ;;  %vm1014_vm12 = vweird.f32 %v3406_v12  ;;  %v1051_v62 = vsub.f32 1.5, %v1050_v27 }
 0x155   : > { %v3604_v44 = vmul.f32 %v1134_v5, %v1066_v3  ;;  %v1026_v17 = vsel %vm3599_vm11, %v3387_v56, %v1022_v37  ;;  %vm1015_vm13 = vmor %vm1013_vm10, %vm1014_vm12  ;;  %v1041_v28 = vsub.f32 1.5, %v1040_v9  ;;  %v1069_v16 = vmul.f32 %v3571_v52, %v1068_v63  ;;  %v1133_v5 = vld [vmem:[%s2960_s7 + $0xd0] sm:$0xff] }
 0x156   : > { %v1090_v61 = vmul.f32 0.5, %v1089_v60  ;;  %v1016_v47 = vsel %vm1015_vm13, %v3406_v12, %v1012_v32  ;;  %vm1094_vm14 = vweird.f32 %v2057_v26  ;;  %v1080_v27 = vmul.f32 0.5, %v1079_v36 }
 0x157   : > { %v3613_v58 = vpop.eup %2060  ;;  %vm1093_vm15 = vweird.f32 %v3513_v42  ;;  %v3616_v43 = vmul.f32 %v1130_v51, %v1026_v17  ;;  %v3619_v56 = vmul.f32 %v1129_v48, %v1016_v47  ;;  %v1052_v18 = vmul.f32 %v3470_v8, %v1051_v62  ;;  %v1137_v42 = vld [vmem:[%s2960_s7 + $0xf0] sm:$0xff]  ;;  %v1136_v51 = vld [vmem:[%s2960_s7 + $0xe8] sm:$0xff] }
 0x158   : > { %v1091_v57 = vsub.f32 1.5, %v1090_v61  ;;  %vm1054_vm0 = vweird.f32 %v3470_v8  ;;  %v1070_v12 = vmul.f32 0.5, %v1069_v16  ;;  %v1098_v37 = vmul.f32 %v3613_v58, %v3558_v2  ;;  %vm1095_vm1 = vmor %vm1093_vm15, %vm1094_vm14  ;;  %v1140_v61 = vld [vmem:[%s3656_s10 + $0x8] sm:$0xff]  ;;  %v1135_v16 = vld [vmem:[%s2960_s7 + $0xe0] sm:$0xff] }
 0x159   : > { %v1042_v20 = vmul.f32 %v3496_v39, %v1041_v28  ;;  %vm1044_vm2 = vweird.f32 %v3496_v39  ;;  %vm1053_vm3 = vweird.f32 %v3419_v55  ;;  %vm1043_vm4 = vweird.f32 %v3431_v34  ;;  %v1132_v55 = vld [vmem:[%s2960_s7 + $0xc8] sm:$0xff] }
 0x15a   : > { %1404 = vperm.xlu0 %1997, %v3604_v44   ;;  %v1092_v59 = vmul.f32 %v2057_v26, %v1091_v57  ;;  %vm1055_vm5 = vmor %vm1053_vm3, %vm1054_vm0  ;;  %v1081_v9 = vsub.f32 1.5, %v1080_v27  ;;  %v1071_v60 = vsub.f32 1.5, %v1070_v12  ;;  %v1099_v32 = vmul.f32 %v3613_v58, %v1098_v37  ;;  %v1143_v57 = vld [vmem:[%s3656_s10 + $0x20] sm:$0xff] }
 0x15b   : > { %1379 = vperm.xlu2 %1996, %v3619_v56   ;;  %v1056_v3 = vsel %vm1055_vm5, %v3470_v8, %v1052_v18  ;;  %vm1045_vm6 = vmor %vm1043_vm4, %vm1044_vm2  ;;  %vm1084_vm7 = vweird.f32 %v3556_v45  ;;  %vm1074_vm8 = vweird.f32 %v3571_v52  ;;  %vm1083_vm9 = vweird.f32 %v3511_v11  ;;  %v1139_v27 = vld [vmem:[%s3656_s10] sm:$0xff]  ;;  %v1138_v18 = vld [vmem:[%s2960_s7 + $0xf8] sm:$0xff]  ;;  %s2146_s7 = scalar_lea.hbm %s4076_s3, 1024 }
 0x15c   : > { %1384 = vperm.xlu1 %1995, %v3616_v43   ;;  %v1096_v14 = vsel %vm1095_vm1, %v2057_v26, %v1092_v59  ;;  %v1046_v36 = vsel %vm1045_vm6, %v3496_v39, %v1042_v20  ;;  %v3639_v0 = vmul.f32 %v1133_v5, %v1056_v3  ;;  %v1082_v26 = vmul.f32 %v3556_v45, %v1081_v9  ;;  %vm1085_vm11 = vmor %vm1083_vm9, %vm1084_vm7  ;;  %v4191_v20 = vld [vmem:[#allocation32_spill] sm:$0xff]  ;;  %v1141_v9 = vld [vmem:[%s3656_s10 + $0x10] sm:$0xff]  ;;  %p2148_p2 = scmp.lt.s32.totalorder %s2146_s7, %s2142_s5 }
 0x15d   : > { %v3632_v63 = vmul.f32 %v1137_v42, %v1096_v14  ;;  %v3642_v34 = vmul.f32 %v1132_v55, %v1046_v36  ;;  %v1100_v8 = vmul.f32 0.5, %v1099_v32  ;;  %v1072_v62 = vmul.f32 %v3571_v52, %v1071_v60  ;;  %v4193_v32 = vld [vmem:[#allocation8_spill] sm:$0xff]  ;;  %v1145_v36 = vld [vmem:[%s3656_s10 + $0x30] sm:$0xff]  ;;  %v4194_v55 = vld [vmem:[#allocation6_spill] sm:$0xff] }
 0x15e   : > { %v1204_v39 = vmul.f32 %v3087_v22, %v2760_v21  ;;  %vm1073_vm10 = vweird.f32 %v3516_v50  ;;  %v1086_v17 = vsel %vm1085_vm11, %v3556_v45, %v1082_v26  ;;  %vm1104_vm13 = vweird.f32 %v3613_v58  ;;  %p2149_p3 = por %p2148_p2, %p2147_p1 }
 0x15f   : > { %vm1075_vm12 = vmor %vm1073_vm10, %vm1074_vm8  ;;  %v1101_v11 = vsub.f32 1.5, %v1100_v8  ;;  %v3666_v48 = vmul.f32 %v1136_v51, %v1086_v17  ;;  %v1207_v45 = vmul.f32 %v3144_v13, %v2748_v7  ;;  %vm1103_vm14 = vweird.f32 %v3558_v2  ;;  %v1142_v2 = vld [vmem:[%s3656_s10 + $0x18] sm:$0xff]  ;;  %v1144_v8 = vld [vmem:[%s3656_s10 + $0x28] sm:$0xff] }
 0x160   : > { %v1076_v28 = vsel %vm1075_vm12, %v3571_v52, %v1072_v62  ;;  %v1236_v47 = vsub.f32 %v1140_v61, %v1204_v39  ;;  %v1203_v52 = vmul.f32 %v2997_v23, %v2739_v6  ;;  %vm1105_vm15 = vmor %vm1103_vm14, %vm1104_vm13  ;;  %v1210_v6 = vmul.f32 %v3296_v41, %v2778_v33  ;;  %v1146_v23 = vld [vmem:[%s3656_s10 + $0x38] sm:$0xff]  ;;  %v4192_v33 = vld [vmem:[#allocation10_spill] sm:$0xff]  ;;  %p2150_p5 = pnand %p2149_p3, %p2145_p0 }
 0x161   : > { %v3668_v21 = vmul.f32 %v1135_v16, %v1076_v28  ;;  %v1102_v22 = vmul.f32 %v3613_v58, %v1101_v11  ;;  %v1239_v12 = vsub.f32 %v1143_v57, %v1207_v45  ;;  %v1206_v7 = vmul.f32 %v3142_v54, %v2757_v19  ;;  %v1149_v54 = vld [vmem:[%s3656_s10 + $0x50] sm:$0xff]  ;;  %v4195_v51 = vld [vmem:[#allocation13_spill] sm:$0xff] }
 0x162   : > { %1419 = vperm.xlu0 %1997, %v3632_v63   ;;  %v1235_v37 = vsub.f32 %v1139_v27, %v1203_v52  ;;  %v1242_v3 = vsub.f32 %v1146_v23, %v1210_v6  ;;  %v1213_v41 = vmul.f32 %v3370_v46, %v4192_v33  ;;  %v1209_v19 = vmul.f32 %v3223_v49, %v4193_v32  ;;  %v4196_v11 = vld [vmem:[#allocation11_spill] sm:$0xff]  ;;  %v4197_v28 = vld [vmem:[#allocation33_spill] sm:$0xff]  ;;  %v4201_v23 = vld [vmem:[#allocation34_spill] sm:$0xff] }
 0x163   : > { %1394 = vperm.xlu2 %1996, %v3642_v34   ;;  %v1106_v59 = vsel %vm1105_vm15, %v3613_v58, %v1102_v22  ;;  %v4190_v58 = vld [vmem:[#allocation5_spill] sm:$0xff]  ;;  %v1238_v5 = vsub.f32 %v1142_v2, %v1206_v7  ;;  %v1208_v26 = vmul.f32 %v3203_v4, %v4194_v55  ;;  %v1216_v49 = vmul.f32 %v3451_v15, %v4195_v51  ;;  %v1148_v4 = vld [vmem:[%s3656_s10 + $0x48] sm:$0xff]  ;;  %v4198_v22 = vld [vmem:[#allocation7_spill] sm:$0xff] }
 0x164   : > { %1399 = vperm.xlu1 %1995, %v3639_v0   ;;  %v3685_v42 = vmul.f32 %v1138_v18, %v1106_v59  ;;  %v1205_v14 = vmul.f32 %v4191_v20, %v4190_v58  ;;  %v1245_v39 = vsub.f32 %v1149_v54, %v1213_v41  ;;  %v1241_v61 = vsub.f32 %v1145_v36, %v1209_v19  ;;  %v1147_v52 = vld [vmem:[%s3656_s10 + $0x40] sm:$0xff]  ;;  %v4200_v7 = vld [vmem:[#allocation14_spill] sm:$0xff]  ;;  %v4203_v41 = vld [vmem:[#allocation19_spill] sm:$0xff] }
 0x165   : > { %v1240_v17 = vsub.f32 %v1144_v8, %v1208_v26  ;;  %v1212_v16 = vmul.f32 %v4197_v28, %v4196_v11  ;;  %v1211_v45 = vmul.f32 %v3277_v24, %v4198_v22  ;;  %v1215_v24 = vmul.f32 %v4201_v23, %v4200_v7  ;;  %v1155_v2 = vld [vmem:[%s3656_s10 + $0x80] sm:$0xff]  ;;  %v1154_v36 = vld [vmem:[%s3656_s10 + $0x78] sm:$0xff]  ;;  %v1164_v23 = vld [vmem:[%s3656_s10 + $0xc8] sm:$0xff] }
 0x166   : > { %v3673_v50 = vpop.permute.xlu2 %1274  ;;  %v1237_v60 = vsub.f32 %v1141_v9, %v1205_v14  ;;  %v1151_v58 = vld [vmem:[%s3656_s10 + $0x60] sm:$0xff]  ;;  %v1150_v9 = vld [vmem:[%s3656_s10 + $0x58] sm:$0xff]  ;;  %v1222_v32 = vmul.f32 %v3576_v38, %v4203_v41  ;;  %v4206_v38 = vld [vmem:[#allocation22_spill] sm:$0xff] }
 0x167   : > { %v1244_v27 = vsub.f32 %v1148_v4, %v1212_v16  ;;  %v1243_v18 = vsub.f32 %v1147_v52, %v1211_v45  ;;  %v4202_v20 = vld [vmem:[#allocation9_spill] sm:$0xff]  ;;  %v4205_v55 = vld [vmem:[#allocation12_spill] sm:$0xff]  ;;  %v4208_v4 = vld [vmem:[#allocation15_spill] sm:$0xff] }
 0x168   : > { %v1214_v14 = vmul.f32 %v3359_v53, %v4202_v20  ;;  %v4204_v19 = vld [vmem:[#allocation17_spill] sm:$0xff]  ;;  %v1158_v53 = vld [vmem:[%s3656_s10 + $0x98] sm:$0xff]  ;;  %v1217_v26 = vmul.f32 %v3433_v40, %v4205_v55  ;;  %v1161_v40 = vld [vmem:[%s3656_s10 + $0xb0] sm:$0xff]  ;;  %v1220_v22 = vmul.f32 %v3519_v25, %v4208_v4 }
 0x169   : > { %v1218_v54 = vmul.f32 %v3319_v35, %v4204_v19  ;;  %v4207_v11 = vld [vmem:[#allocation20_spill] sm:$0xff]  ;;  %v1156_v45 = vld [vmem:[%s3656_s10 + $0x88] sm:$0xff]  ;;  %v1163_v19 = vld [vmem:[%s3656_s10 + $0xc0] sm:$0xff] }
 0x16a   : > { %1498 = vperm.xlu0 %1997, %v1236_v47   ;;  %v1152_v47 = vld [vmem:[%s3656_s10 + $0x68] sm:$0xff]  ;;  %v1221_v28 = vmul.f32 %v3397_v29, %v4207_v11  ;;  %v4209_v29 = vld [vmem:[#allocation25_spill] sm:$0xff]  ;;  %v1166_v11 = vld [vmem:[%s3656_s10 + $0xd8] sm:$0xff] }
 0x16b   : > { %1409 = vperm.xlu2 %1996, %v3668_v21   ;;  %v1248_v57 = vsub.f32 %v1152_v47, %v1216_v49  ;;  %v1225_v49 = vmul.f32 %v3619_v56, %v4206_v38  ;;  %v1157_v47 = vld [vmem:[%s3656_s10 + $0x90] sm:$0xff]  ;;  %v1160_v25 = vld [vmem:[%s3656_s10 + $0xa8] sm:$0xff] }
 0x16c   : > { %1414 = vperm.xlu1 %1995, %v3666_v48   ;;  %v1253_v56 = vsub.f32 %v1157_v47, %v1221_v28  ;;  %v4217_v28 = vld [vmem:[#allocation24_spill] sm:$0xff]  ;;  %v1165_v47 = vld [vmem:[%s3656_s10 + $0xd0] sm:$0xff] }
 0x16e   : > { %v3693_v13 = vpop.permute.xlu2 %1284 }
 0x172   : > { %1513 = vperm.xlu0 %1997, %v1239_v12   ;;  %v3710_v46 = vpop.permute.xlu1 %1269  ;;  %v4199_v12 = vld [vmem:[#allocation16_spill] sm:$0xff] }
 0x173   : > { %1424 = vperm.xlu2 %1996, %v3685_v42  }
 0x174   : > { %1493 = vperm.xlu1 %1995, %v1235_v37   ;;  %v1219_v37 = vmul.f32 %v3521_v1, %v4199_v12 }
 0x179   : > { %v3708_v62 = vpop.permute.xlu2 %1294 }
 0x17a   : > { %1528 = vperm.xlu0 %1997, %v1242_v3   ;;  %v1251_v3 = vsub.f32 %v1155_v2, %v1219_v37  ;;  %v4210_v37 = vld [vmem:[#allocation23_spill] sm:$0xff] }
 0x17b   : > { %1503 = vperm.xlu2 %1996, %v1237_v60   ;;  %v1246_v60 = vsub.f32 %v1150_v9, %v1214_v14  ;;  %v1224_v7 = vmul.f32 %v3501_v10, %v4210_v37  ;;  %v1168_v37 = vld [vmem:[%s3656_s10 + $0xe8] sm:$0xff] }
 0x17c   : > { %1508 = vperm.xlu1 %1995, %v1238_v5   ;;  %v1247_v5 = vsub.f32 %v1151_v58, %v1215_v24  ;;  %v4211_v24 = vld [vmem:[#allocation18_spill] sm:$0xff]  ;;  %v1159_v58 = vld [vmem:[%s3656_s10 + $0xa0] sm:$0xff] }
 0x17d   : > { %v3723_v15 = vpop.permute.xlu0 %1279  ;;  %v1223_v2 = vmul.f32 %v3567_v30, %v4211_v24  ;;  %v1256_v9 = vsub.f32 %v1160_v25, %v1224_v7  ;;  %v1167_v30 = vld [vmem:[%s3656_s10 + $0xe0] sm:$0xff] }
 0x182   : > { %1543 = vperm.xlu0 %1997, %v1245_v39   ;;  %v1153_v39 = vld [vmem:[%s3656_s10 + $0x70] sm:$0xff] }
 0x183   : > { %1518 = vperm.xlu2 %1996, %v1240_v17   ;;  %v1250_v17 = vsub.f32 %v1154_v36, %v1218_v54  ;;  %v1249_v51 = vsub.f32 %v1153_v39, %v1217_v26  ;;  %v4214_v54 = vld [vmem:[#allocation21_spill] sm:$0xff]  ;;  %v1162_v36 = vld [vmem:[%s3656_s10 + $0xb8] sm:$0xff] }
 0x184   : > { %1523 = vperm.xlu1 %1995, %v1241_v61   ;;  %v1254_v61 = vsub.f32 %v1158_v53, %v1222_v32  ;;  %v1226_v53 = vmul.f32 %v3616_v43, %v4214_v54  ;;  %v1170_v43 = vld [vmem:[%s3656_s10 + $0xf8] sm:$0xff]  ;;  %v2064_v54 = vld [vmem:[%s2292_s30 + $0x10] sm:$0xff] }
 0x186   : > { %v3727_v6 = vpop.permute.xlu1 %1289 }
 0x187   : > { %v3721_v59 = vpop.permute.xlu2 %1304 }
 0x18a   : > { %1558 = vperm.xlu0 %1997, %v1248_v57   ;;  %v1257_v57 = vsub.f32 %v1161_v40, %v1225_v49  ;;  %v1229_v40 = vmul.f32 %v3639_v0, %v4217_v28  ;;  %v4219_v0 = vld [vmem:[#allocation27_spill] sm:$0xff] }
 0x18b   : > { %1533 = vperm.xlu2 %1996, %v1243_v18   ;;  %v1228_v18 = vmul.f32 %v3642_v34, %v4209_v29  ;;  %v1255_v34 = vsub.f32 %v1159_v58, %v1223_v2  ;;  %v1169_v29 = vld [vmem:[%s3656_s10 + $0xf0] sm:$0xff] }
 0x18c   : > { %1538 = vperm.xlu1 %1995, %v1244_v27   ;;  %v1252_v27 = vsub.f32 %v1156_v45, %v1220_v22  ;;  %v1261_v45 = vsub.f32 %v1165_v47, %v1229_v40 }
 0x18d   : > { %v3738_v33 = vpop.permute.xlu0 %1314  ;;  %v1260_v14 = vsub.f32 %v1164_v23, %v1228_v18  ;;  %v1232_v18 = vmul.f32 %v3666_v48, %v4219_v0  ;;  %v2072_v0 = vld [vmem:[%s2292_s30 + $0x88] sm:$0xff] }
 0x18f   : > { %v1264_v23 = vsub.f32 %v1168_v37, %v1232_v18 }
 0x191   : > { %v3736_v1 = vpop.permute.xlu2 %1319 }
 0x192   : > { %1573 = vperm.xlu0 %1997, %v1251_v3  }
 0x193   : > { %1548 = vperm.xlu2 %1996, %v1246_v60   ;;  %v4213_v60 = vld [vmem:[#allocation26_spill] sm:$0xff] }
 0x194   : > { %1553 = vperm.xlu1 %1995, %v1247_v5   ;;  %v3748_v8 = vpop.permute.xlu1 %1299  ;;  %v4212_v5 = vld [vmem:[#allocation28_spill] sm:$0xff]  ;;  %v1227_v41 = vmul.f32 %v3560_v31, %v4213_v60  ;;  %v4215_v31 = vld [vmem:[#allocation30_spill] sm:$0xff] }
 0x195   : > { %v1231_v10 = vmul.f32 %v3668_v21, %v4212_v5  ;;  %v1258_v21 = vsub.f32 %v1162_v36, %v1226_v53  ;;  %v2063_v5 = vld [vmem:[%s2292_s30 + $0x28] sm:$0xff]  ;;  %v1429_v53 = vmul.f32 %v2064_v54, %v3673_v50  ;;  %v2065_v36 = vld [vmem:[%s2292_s30 + $0x18] sm:$0xff] }
 0x196   : > { %v1259_v26 = vsub.f32 %v1163_v19, %v1227_v41 }
 0x197   : > { %v1263_v55 = vsub.f32 %v1167_v30, %v1231_v10  ;;  %v1432_v10 = vmul.f32 %v2063_v5, %v3723_v15 }
 0x198   : > { %v3758_v16 = vpop.permute.xlu0 %1329 }
 0x19a   : > { %1588 = vperm.xlu0 %1997, %v1254_v61  }
 0x19b   : > { %1563 = vperm.xlu2 %1996, %v1249_v51   ;;  %v4216_v51 = vld [vmem:[#allocation29_spill] sm:$0xff] }
 0x19c   : > { %1568 = vperm.xlu1 %1995, %v1250_v17   ;;  %v3753_v35 = vpop.permute.xlu2 %1334  ;;  %v3764_v52 = vpop.permute.xlu1 %1309  ;;  %v1234_v17 = vmul.f32 %v3685_v42, %v4215_v31  ;;  %v1230_v38 = vmul.f32 %v3604_v44, %v4216_v51  ;;  %v4218_v44 = vld [vmem:[#allocation31_spill] sm:$0xff]  ;;  %v2067_v31 = vld [vmem:[%s2292_s30 + $0x58] sm:$0xff] }
 0x19d   : > { %v1444_v18 = vmul.f32 %v2072_v0, %v3764_v52 }
 0x19e   : > { %v1266_v4 = vsub.f32 %v1170_v43, %v1234_v17  ;;  %v1262_v22 = vsub.f32 %v1166_v11, %v1230_v38  ;;  %v1438_v17 = vmul.f32 %v2067_v31, %v3708_v62 }
 0x1a2   : > { %1603 = vperm.xlu0 %1997, %v1257_v57  }
 0x1a3   : > { %1578 = vperm.xlu2 %1996, %v1252_v27   ;;  %v3777_v20 = vpop.permute.xlu0 %1344 }
 0x1a4   : > { %1583 = vperm.xlu1 %1995, %v1253_v56   ;;  %v1233_v56 = vmul.f32 %v3632_v63, %v4218_v44 }
 0x1a5   : > { %v3768_v12 = vpop.permute.xlu2 %1349 }
 0x1a6   : > { %v1265_v7 = vsub.f32 %v1169_v29, %v1233_v56  ;;  %v2071_v56 = vld [vmem:[%s2292_s30 + $0x80] sm:$0xff] }
 0x1a7   : > { %v3779_v3 = vpop.permute.xlu1 %1324  ;;  %v1443_v29 = vmul.f32 %v2071_v56, %v3764_v52  ;;  %v2074_v52 = vld [vmem:[%s2292_s30 + $0x70] sm:$0xff] }
 0x1aa   : > { %1618 = vperm.xlu0 %1997, %v1260_v14  }
 0x1ab   : > { %1593 = vperm.xlu2 %1996, %v1255_v34  }
 0x1ac   : > { %1598 = vperm.xlu1 %1995, %v1256_v9   ;;  %v2062_v9 = vld [vmem:[%s2292_s30 + $0x20] sm:$0xff] }
 0x1ad   : > { %v3786_v32 = vpop.permute.xlu2 %1364  ;;  %v1431_v34 = vmul.f32 %v2062_v9, %v3723_v15  ;;  %v1430_v15 = vmul.f32 %v2065_v36, %v3673_v50  ;;  %v2068_v50 = vld [vmem:[%s2292_s30 + $0x40] sm:$0xff] }
 0x1ae   : > { %v3792_v39 = vpop.permute.xlu0 %1359  ;;  %v1435_v47 = vmul.f32 %v2068_v50, %v3727_v6 }
 0x1b1   : > { %v3794_v61 = vpop.permute.xlu1 %1339 }
 0x1b2   : > { %1633 = vperm.xlu0 %1997, %v1263_v55  }
 0x1b3   : > { %1608 = vperm.xlu2 %1996, %v1258_v21  }
 0x1b4   : > { %1613 = vperm.xlu1 %1995, %v1259_v26   ;;  %v2066_v26 = vld [vmem:[%s2292_s30 + $0x50] sm:$0xff] }
 0x1b5   : > { %v3801_v49 = vpop.permute.xlu2 %1379  ;;  %v1437_v21 = vmul.f32 %v2066_v26, %v3708_v62 }
 0x1ba   : > { %1648 = vperm.xlu0 %1997, %v1266_v4   ;;  %v3807_v57 = vpop.permute.xlu0 %1374  ;;  %v2069_v4 = vld [vmem:[%s2292_s30] sm:$0xff] }
 0x1bb   : > { %1623 = vperm.xlu2 %1996, %v1261_v45   ;;  %v1427_v62 = vmul.f32 %v2069_v4, %v3710_v46 }
 0x1bc   : > { %1628 = vperm.xlu1 %1995, %v1262_v22   ;;  %v3809_v42 = vpop.permute.xlu1 %1354  ;;  %v2070_v22 = vld [vmem:[%s2292_s30 + $0x8] sm:$0xff] }
 0x1bd   : > { %v3813_v27 = vpop.permute.xlu2 %1394  ;;  %v1428_v45 = vmul.f32 %v2070_v22, %v3710_v46 }
 0x1c3   : > { %1638 = vperm.xlu2 %1996, %v1264_v23   ;;  %v2073_v23 = vld [vmem:[%s2292_s30 + $0x48] sm:$0xff] }
 0x1c4   : > { %1643 = vperm.xlu1 %1995, %v1265_v7   ;;  %v3819_v25 = vpop.permute.xlu0 %1389  ;;  %v1436_v9 = vmul.f32 %v2073_v23, %v3727_v6  ;;  %v2075_v6 = vld [vmem:[%s2292_s30 + $0x30] sm:$0xff] }
 0x1c5   : > { %v3823_v2 = vpop.permute.xlu2 %1409  ;;  %v1433_v54 = vmul.f32 %v2075_v6, %v3693_v13  ;;  %v2088_v6 = vld [vmem:[%s2292_s30 + $0x98] sm:$0xff] }
 0x1c6   : > { %v3821_v24 = vpop.permute.xlu1 %1369 }
 0x1cc   : > { %v3825_v63 = vpop.permute.xlu0 %1404 }
 0x1cd   : > { %v3829_v14 = vpop.permute.xlu2 %1424 }
 0x1ce   : > { %v3827_v58 = vpop.permute.xlu1 %1384 }
 0x1d4   : > { %v3834_v48 = vpop.permute.xlu0 %1419 }
 0x1d5   : > { %v1504_v41 = vpop.permute.xlu2 %1503 }
 0x1d6   : > { %v3840_v60 = vpop.permute.xlu1 %1399  ;;  %v1655_v30 = vadd.f32 %v1504_v41, %v1431_v34  ;;  %v1656_v19 = vadd.f32 %v1504_v41, %v1432_v10 }
 0x1d8   : > { %1719 = vst [vmem:[%s3842_s19 + $0x20] sm:$0xff] %v1655_v30 }
 0x1d9   : > { %1720 = vst [vmem:[%s3842_s19 + $0x28] sm:$0xff] %v1656_v19  ;;  %v1441_v19 = vmul.f32 %v2074_v52, %v3721_v59 }
 0x1dc   : > { %v1499_v55 = vpop.permute.xlu0 %1498 }
 0x1dd   : > { %v1653_v38 = vadd.f32 %v1499_v55, %v1429_v53  ;;  %v1654_v43 = vadd.f32 %v1499_v55, %v1430_v15  ;;  %v1519_v11 = vpop.permute.xlu2 %1518  ;;  %v2076_v53 = vld [vmem:[%s2292_s30 + $0x38] sm:$0xff]  ;;  %v2077_v55 = vld [vmem:[%s2292_s30 + $0xb0] sm:$0xff] }
 0x1de   : > { %v3854_v51 = vpop.permute.xlu1 %1414  ;;  %v1661_v28 = vadd.f32 %v1519_v11, %v1437_v21  ;;  %v1662_v40 = vadd.f32 %v1519_v11, %v1438_v17  ;;  %v1434_v36 = vmul.f32 %v2076_v53, %v3693_v13  ;;  %v1449_v26 = vmul.f32 %v2077_v55, %v3779_v3  ;;  %v2078_v21 = vld [vmem:[%s2292_s30 + $0xb8] sm:$0xff] }
 0x1df   : > { %1717 = vst [vmem:[%s3842_s19 + $0x10] sm:$0xff] %v1653_v38  ;;  %v1450_v31 = vmul.f32 %v2078_v21, %v3779_v3  ;;  %v2080_v3 = vld [vmem:[%s2292_s30 + $0xa0] sm:$0xff]  ;;  %v2090_v55 = vld [vmem:[%s2292_s30 + $0x118] sm:$0xff] }
 0x1e0   : > { %1718 = vst [vmem:[%s3842_s19 + $0x18] sm:$0xff] %v1654_v43  ;;  %v2079_v43 = vld [vmem:[%s2292_s30 + $0x78] sm:$0xff] }
 0x1e1   : > { %1725 = vst [vmem:[%s3842_s19 + $0x50] sm:$0xff] %v1661_v28  ;;  %v1442_v13 = vmul.f32 %v2079_v43, %v3721_v59  ;;  %v2081_v59 = vld [vmem:[%s2292_s30 + $0x60] sm:$0xff] }
 0x1e2   : > { %1726 = vst [vmem:[%s3842_s19 + $0x58] sm:$0xff] %v1662_v40  ;;  %v1439_v22 = vmul.f32 %v2081_v59, %v3748_v8  ;;  %v2095_v59 = vld [vmem:[%s2292_s30 + $0x140] sm:$0xff] }
 0x1e4   : > { %v1514_v44 = vpop.permute.xlu0 %1513 }
 0x1e5   : > { %v1659_v7 = vadd.f32 %v1514_v44, %v1435_v47  ;;  %v1534_v5 = vpop.permute.xlu2 %1533  ;;  %v1660_v30 = vadd.f32 %v1514_v44, %v1436_v9  ;;  %v2085_v9 = vld [vmem:[%s2292_s30 + $0xa8] sm:$0xff] }
 0x1e6   : > { %v1494_v37 = vpop.permute.xlu1 %1493  ;;  %v1667_v10 = vadd.f32 %v1534_v5, %v1443_v29  ;;  %v1668_v41 = vadd.f32 %v1534_v5, %v1444_v18  ;;  %v2083_v29 = vld [vmem:[%s2292_s30 + $0xe0] sm:$0xff]  ;;  %v2084_v18 = vld [vmem:[%s2292_s30 + $0xe8] sm:$0xff] }
 0x1e7   : > { %v1651_v46 = vadd.f32 %v1494_v37, %v1427_v62  ;;  %v1652_v34 = vadd.f32 %v1494_v37, %v1428_v45  ;;  %1723 = vst [vmem:[%s3842_s19 + $0x40] sm:$0xff] %v1659_v7  ;;  %v1447_v62 = vmul.f32 %v2080_v3, %v3736_v1  ;;  %v2082_v45 = vld [vmem:[%s2292_s30 + $0x68] sm:$0xff]  ;;  %v1455_v0 = vmul.f32 %v2083_v29, %v3794_v61 }
 0x1e8   : > { %1731 = vst [vmem:[%s3842_s19 + $0x80] sm:$0xff] %v1667_v10  ;;  %v1440_v44 = vmul.f32 %v2082_v45, %v3748_v8  ;;  %v1456_v37 = vmul.f32 %v2084_v18, %v3794_v61  ;;  %v1448_v8 = vmul.f32 %v2085_v9, %v3736_v1  ;;  %v2086_v61 = vld [vmem:[%s2292_s30 + $0xd0] sm:$0xff]  ;;  %v2096_v45 = vld [vmem:[%s2292_s30 + $0x148] sm:$0xff] }
 0x1e9   : > { %1715 = vst [vmem:[%s3842_s19] sm:$0xff] %v1651_v46  ;;  %v1453_v52 = vmul.f32 %v2086_v61, %v3753_v35  ;;  %v2087_v1 = vld [vmem:[%s2292_s30 + $0x90] sm:$0xff] }
 0x1ea   : > { %1716 = vst [vmem:[%s3842_s19 + $0x8] sm:$0xff] %v1652_v34 }
 0x1eb   : > { %1732 = vst [vmem:[%s3842_s19 + $0x88] sm:$0xff] %v1668_v41 }
 0x1ec   : > { %1724 = vst [vmem:[%s3842_s19 + $0x48] sm:$0xff] %v1660_v30  ;;  %v1529_v15 = vpop.permute.xlu0 %1528 }
 0x1ed   : > { %v1665_v38 = vadd.f32 %v1529_v15, %v1441_v19  ;;  %v1549_v40 = vpop.permute.xlu2 %1548  ;;  %v1666_v4 = vadd.f32 %v1529_v15, %v1442_v13  ;;  %v1445_v19 = vmul.f32 %v2087_v1, %v3738_v33 }
 0x1ee   : > { %v1509_v17 = vpop.permute.xlu1 %1508  ;;  %v1673_v50 = vadd.f32 %v1549_v40, %v1449_v26  ;;  %v1674_v47 = vadd.f32 %v1549_v40, %v1450_v31  ;;  %v1462_v26 = vmul.f32 %v2090_v55, %v3809_v42 }
 0x1ef   : > { %v1657_v11 = vadd.f32 %v1509_v17, %v1433_v54  ;;  %v1658_v28 = vadd.f32 %v1509_v17, %v1434_v36  ;;  %1729 = vst [vmem:[%s3842_s19 + $0x70] sm:$0xff] %v1665_v38  ;;  %v1446_v54 = vmul.f32 %v2088_v6, %v3738_v33  ;;  %v2089_v36 = vld [vmem:[%s2292_s30 + $0x110] sm:$0xff]  ;;  %v2091_v17 = vld [vmem:[%s2292_s30 + $0xd8] sm:$0xff] }
 0x1f0   : > { %1737 = vst [vmem:[%s3842_s19 + $0xb0] sm:$0xff] %v1673_v50  ;;  %v1461_v15 = vmul.f32 %v2089_v36, %v3809_v42  ;;  %v1454_v33 = vmul.f32 %v2091_v17, %v3753_v35  ;;  %v2092_v42 = vld [vmem:[%s2292_s30 + $0x100] sm:$0xff] }
 0x1f1   : > { %1721 = vst [vmem:[%s3842_s19 + $0x30] sm:$0xff] %v1657_v11  ;;  %v1459_v50 = vmul.f32 %v2092_v42, %v3768_v12  ;;  %v2093_v35 = vld [vmem:[%s2292_s30 + $0xc0] sm:$0xff] }
 0x1f2   : > { %1722 = vst [vmem:[%s3842_s19 + $0x38] sm:$0xff] %v1658_v28 }
 0x1f3   : > { %1738 = vst [vmem:[%s3842_s19 + $0xb8] sm:$0xff] %v1674_v47  ;;  %v1451_v47 = vmul.f32 %v2093_v35, %v3758_v16  ;;  %v2109_v35 = vld [vmem:[%s2292_s30 + $0x168] sm:$0xff] }
 0x1f4   : > { %1730 = vst [vmem:[%s3842_s19 + $0x78] sm:$0xff] %v1666_v4  ;;  %v1544_v56 = vpop.permute.xlu0 %1543  ;;  %v2094_v4 = vld [vmem:[%s2292_s30 + $0xc8] sm:$0xff] }
 0x1f5   : > { %v1671_v23 = vadd.f32 %v1544_v56, %v1447_v62  ;;  %v1564_v5 = vpop.permute.xlu2 %1563  ;;  %v1672_v30 = vadd.f32 %v1544_v56, %v1448_v8  ;;  %v1452_v3 = vmul.f32 %v2094_v4, %v3758_v16 }
 0x1f6   : > { %v1524_v7 = vpop.permute.xlu1 %1523  ;;  %v1679_v10 = vadd.f32 %v1564_v5, %v1455_v0  ;;  %v1680_v41 = vadd.f32 %v1564_v5, %v1456_v37  ;;  %v2097_v0 = vld [vmem:[%s2292_s30 + $0x108] sm:$0xff]  ;;  %v2100_v5 = vld [vmem:[%s2292_s30 + $0xf8] sm:$0xff] }
 0x1f7   : > { %v1663_v46 = vadd.f32 %v1524_v7, %v1439_v22  ;;  %v1664_v34 = vadd.f32 %v1524_v7, %v1440_v44  ;;  %1735 = vst [vmem:[%s3842_s19 + $0xa0] sm:$0xff] %v1671_v23  ;;  %v1467_v22 = vmul.f32 %v2095_v59, %v3821_v24  ;;  %v1468_v44 = vmul.f32 %v2096_v45, %v3821_v24  ;;  %v2098_v24 = vld [vmem:[%s2292_s30 + $0x130] sm:$0xff] }
 0x1f8   : > { %1743 = vst [vmem:[%s3842_s19 + $0xe0] sm:$0xff] %v1679_v10  ;;  %v1460_v16 = vmul.f32 %v2097_v0, %v3768_v12  ;;  %v2099_v12 = vld [vmem:[%s2292_s30 + $0xf0] sm:$0xff]  ;;  %v1458_v10 = vmul.f32 %v2100_v5, %v3777_v20 }
 0x1f9   : > { %1727 = vst [vmem:[%s3842_s19 + $0x60] sm:$0xff] %v1663_v46  ;;  %v1465_v46 = vmul.f32 %v2098_v24, %v3786_v32 }
 0x1fa   : > { %1728 = vst [vmem:[%s3842_s19 + $0x68] sm:$0xff] %v1664_v34  ;;  %v1457_v34 = vmul.f32 %v2099_v12, %v3777_v20 }
 0x1fb   : > { %1744 = vst [vmem:[%s3842_s19 + $0xe8] sm:$0xff] %v1680_v41 }
 0x1fc   : > { %1736 = vst [vmem:[%s3842_s19 + $0xa8] sm:$0xff] %v1672_v30  ;;  %v1559_v53 = vpop.permute.xlu0 %1558  ;;  %v2101_v30 = vld [vmem:[%s2292_s30 + $0x170] sm:$0xff] }
 0x1fd   : > { %v1677_v31 = vadd.f32 %v1559_v53, %v1453_v52  ;;  %v1579_v13 = vpop.permute.xlu2 %1578  ;;  %v1678_v40 = vadd.f32 %v1559_v53, %v1454_v33  ;;  %v1473_v61 = vmul.f32 %v2101_v30, %v3827_v58  ;;  %v2102_v52 = vld [vmem:[%s2292_s30 + $0x178] sm:$0xff]  ;;  %v2106_v33 = vld [vmem:[%s2292_s30 + $0x128] sm:$0xff] }
 0x1fe   : > { %v1539_v21 = vpop.permute.xlu1 %1538  ;;  %v1685_v11 = vadd.f32 %v1579_v13, %v1461_v15  ;;  %v1686_v28 = vadd.f32 %v1579_v13, %v1462_v26  ;;  %v1474_v1 = vmul.f32 %v2102_v52, %v3827_v58  ;;  %v2104_v58 = vld [vmem:[%s2292_s30 + $0x160] sm:$0xff] }
 0x1ff   : > { %v1669_v38 = vadd.f32 %v1539_v21, %v1445_v19  ;;  %v1670_v43 = vadd.f32 %v1539_v21, %v1446_v54  ;;  %1741 = vst [vmem:[%s3842_s19 + $0xd0] sm:$0xff] %v1677_v31  ;;  %v2103_v54 = vld [vmem:[%s2292_s30 + $0x138] sm:$0xff]  ;;  %v1471_v31 = vmul.f32 %v2104_v58, %v3801_v49  ;;  %v2107_v13 = vld [vmem:[%s2292_s30 + $0x1a0] sm:$0xff] }
 0x200   : > { %1749 = vst [vmem:[%s3842_s19 + $0x110] sm:$0xff] %v1685_v11  ;;  %v1466_v20 = vmul.f32 %v2103_v54, %v3786_v32  ;;  %v2105_v32 = vld [vmem:[%s2292_s30 + $0x120] sm:$0xff]  ;;  %v1479_v11 = vmul.f32 %v2107_v13, %v3840_v60 }
 0x201   : > { %1733 = vst [vmem:[%s3842_s19 + $0x90] sm:$0xff] %v1669_v38  ;;  %v1463_v17 = vmul.f32 %v2105_v32, %v3792_v39  ;;  %v1464_v38 = vmul.f32 %v2106_v33, %v3792_v39  ;;  %v1472_v39 = vmul.f32 %v2109_v35, %v3801_v49  ;;  %v2111_v49 = vld [vmem:[%s2292_s30 + $0x150] sm:$0xff] }
 0x202   : > { %1734 = vst [vmem:[%s3842_s19 + $0x98] sm:$0xff] %v1670_v43 }
 0x203   : > { %1750 = vst [vmem:[%s3842_s19 + $0x118] sm:$0xff] %v1686_v28  ;;  %v2108_v28 = vld [vmem:[%s2292_s30 + $0x1a8] sm:$0xff] }
 0x204   : > { %1742 = vst [vmem:[%s3842_s19 + $0xd8] sm:$0xff] %v1678_v40  ;;  %v1574_v62 = vpop.permute.xlu0 %1573  ;;  %v1480_v40 = vmul.f32 %v2108_v28, %v3840_v60  ;;  %v2110_v60 = vld [vmem:[%s2292_s30 + $0x190] sm:$0xff]  ;;  %v2125_v28 = vld [vmem:[%s2292_s30 + $0x1e8] sm:$0xff] }
 0x205   : > { %v1683_v29 = vadd.f32 %v1574_v62, %v1459_v50  ;;  %v1594_v7 = vpop.permute.xlu2 %1593  ;;  %v1684_v8 = vadd.f32 %v1574_v62, %v1460_v16  ;;  %v1477_v45 = vmul.f32 %v2110_v60, %v3813_v27  ;;  %v2113_v16 = vld [vmem:[%s2292_s30 + $0x1d0] sm:$0xff] }
 0x206   : > { %v1554_v56 = vpop.permute.xlu1 %1553  ;;  %v1691_v23 = vadd.f32 %v1594_v7, %v1467_v22  ;;  %v1692_v9 = vadd.f32 %v1594_v7, %v1468_v44  ;;  %v1469_v44 = vmul.f32 %v2111_v49, %v3807_v57 }
 0x207   : > { %v1675_v18 = vadd.f32 %v1554_v56, %v1451_v47  ;;  %v1676_v37 = vadd.f32 %v1554_v56, %v1452_v3  ;;  %1747 = vst [vmem:[%s3842_s19 + $0x100] sm:$0xff] %v1683_v29  ;;  %v2112_v56 = vld [vmem:[%s2292_s30 + $0x158] sm:$0xff] }
 0x208   : > { %1755 = vst [vmem:[%s3842_s19 + $0x140] sm:$0xff] %v1691_v23  ;;  %v1470_v29 = vmul.f32 %v2112_v56, %v3807_v57 }
 0x209   : > { %1739 = vst [vmem:[%s3842_s19 + $0xc0] sm:$0xff] %v1675_v18  ;;  %v1485_v18 = vmul.f32 %v2113_v16, %v3854_v51 }
 0x20a   : > { %1740 = vst [vmem:[%s3842_s19 + $0xc8] sm:$0xff] %v1676_v37  ;;  %v2114_v37 = vld [vmem:[%s2292_s30 + $0x1d8] sm:$0xff] }
 0x20b   : > { %1756 = vst [vmem:[%s3842_s19 + $0x148] sm:$0xff] %v1692_v9  ;;  %v1486_v7 = vmul.f32 %v2114_v37, %v3854_v51  ;;  %v2116_v51 = vld [vmem:[%s2292_s30 + $0x1c0] sm:$0xff] }
 0x20c   : > { %1748 = vst [vmem:[%s3842_s19 + $0x108] sm:$0xff] %v1684_v8  ;;  %v1589_v41 = vpop.permute.xlu0 %1588  ;;  %v2115_v8 = vld [vmem:[%s2292_s30 + $0x198] sm:$0xff] }
 0x20d   : > { %v1689_v6 = vadd.f32 %v1589_v41, %v1465_v46  ;;  %v1609_v15 = vpop.permute.xlu2 %1608  ;;  %v1690_v21 = vadd.f32 %v1589_v41, %v1466_v20  ;;  %v1478_v57 = vmul.f32 %v2115_v8, %v3813_v27  ;;  %v1483_v41 = vmul.f32 %v2116_v51, %v3823_v2  ;;  %v2117_v27 = vld [vmem:[%s2292_s30 + $0x1c8] sm:$0xff] }
 0x20e   : > { %v1569_v19 = vpop.permute.xlu1 %1568  ;;  %v1697_v55 = vadd.f32 %v1609_v15, %v1473_v61  ;;  %v1698_v26 = vadd.f32 %v1609_v15, %v1474_v1  ;;  %v1484_v30 = vmul.f32 %v2117_v27, %v3823_v2  ;;  %v2118_v61 = vld [vmem:[%s2292_s30 + $0x180] sm:$0xff]  ;;  %v2119_v1 = vld [vmem:[%s2292_s30 + $0x188] sm:$0xff]  ;;  %v2120_v2 = vld [vmem:[%s2292_s30 + $0x1f0] sm:$0xff] }
 0x20f   : > { %v1681_v53 = vadd.f32 %v1569_v19, %v1457_v34  ;;  %v1682_v36 = vadd.f32 %v1569_v19, %v1458_v10  ;;  %1753 = vst [vmem:[%s3842_s19 + $0x130] sm:$0xff] %v1689_v6  ;;  %v1475_v52 = vmul.f32 %v2118_v61, %v3819_v25  ;;  %v1476_v19 = vmul.f32 %v2119_v1, %v3819_v25  ;;  %v2121_v25 = vld [vmem:[%s2292_s30 + $0x1f8] sm:$0xff] }
 0x210   : > { %1761 = vst [vmem:[%s3842_s19 + $0x170] sm:$0xff] %v1697_v55  ;;  %v1489_v55 = vmul.f32 %v2120_v2, %v3829_v14 }
 0x211   : > { %1745 = vst [vmem:[%s3842_s19 + $0xf0] sm:$0xff] %v1681_v53 }
 0x212   : > { %1746 = vst [vmem:[%s3842_s19 + $0xf8] sm:$0xff] %v1682_v36 }
 0x213   : > { %1762 = vst [vmem:[%s3842_s19 + $0x178] sm:$0xff] %v1698_v26  ;;  %v1490_v26 = vmul.f32 %v2121_v25, %v3829_v14 }
 0x214   : > { %1754 = vst [vmem:[%s3842_s19 + $0x138] sm:$0xff] %v1690_v21  ;;  %v1604_v43 = vpop.permute.xlu0 %1603  ;;  %v2122_v21 = vld [vmem:[%s2292_s30 + $0x1b0] sm:$0xff] }
 0x215   : > { %v1695_v50 = vadd.f32 %v1604_v43, %v1471_v31  ;;  %v1624_v3 = vpop.permute.xlu2 %1623  ;;  %v1696_v22 = vadd.f32 %v1604_v43, %v1472_v39  ;;  %v1481_v58 = vmul.f32 %v2122_v21, %v3825_v63  ;;  %v2123_v31 = vld [vmem:[%s2292_s30 + $0x1b8] sm:$0xff] }
 0x216   : > { %v1584_v42 = vpop.permute.xlu1 %1583  ;;  %v1703_v62 = vadd.f32 %v1624_v3, %v1479_v11  ;;  %v1704_v59 = vadd.f32 %v1624_v3, %v1480_v40  ;;  %v1482_v32 = vmul.f32 %v2123_v31, %v3825_v63  ;;  %v2124_v63 = vld [vmem:[%s2292_s30 + $0x1e0] sm:$0xff]  ;;  %v1488_v40 = vmul.f32 %v2125_v28, %v3834_v48 }
 0x217   : > { %v1687_v47 = vadd.f32 %v1584_v42, %v1463_v17  ;;  %v1688_v4 = vadd.f32 %v1584_v42, %v1464_v38  ;;  %1759 = vst [vmem:[%s3842_s19 + $0x160] sm:$0xff] %v1695_v50  ;;  %v1487_v14 = vmul.f32 %v2124_v63, %v3834_v48 }
 0x218   : > { %1767 = vst [vmem:[%s3842_s19 + $0x1a0] sm:$0xff] %v1703_v62 }
 0x219   : > { %1751 = vst [vmem:[%s3842_s19 + $0x120] sm:$0xff] %v1687_v47 }
 0x21a   : > { %1752 = vst [vmem:[%s3842_s19 + $0x128] sm:$0xff] %v1688_v4 }
 0x21b   : > { %1768 = vst [vmem:[%s3842_s19 + $0x1a8] sm:$0xff] %v1704_v59 }
 0x21c   : > { %1760 = vst [vmem:[%s3842_s19 + $0x168] sm:$0xff] %v1696_v22  ;;  %v1619_v0 = vpop.permute.xlu0 %1618 }
 0x21d   : > { %v1701_v9 = vadd.f32 %v1619_v0, %v1477_v45  ;;  %v1639_v12 = vpop.permute.xlu2 %1638  ;;  %v1702_v10 = vadd.f32 %v1619_v0, %v1478_v57 }
 0x21e   : > { %v1599_v23 = vpop.permute.xlu1 %1598  ;;  %v1709_v34 = vadd.f32 %v1639_v12, %v1485_v18  ;;  %v1710_v5 = vadd.f32 %v1639_v12, %v1486_v7 }
 0x21f   : > { %v1693_v24 = vadd.f32 %v1599_v23, %v1469_v44  ;;  %v1694_v46 = vadd.f32 %v1599_v23, %v1470_v29  ;;  %1765 = vst [vmem:[%s3842_s19 + $0x190] sm:$0xff] %v1701_v9 }
 0x220   : > { %1773 = vst [vmem:[%s3842_s19 + $0x1d0] sm:$0xff] %v1709_v34 }
 0x221   : > { %1757 = vst [vmem:[%s3842_s19 + $0x150] sm:$0xff] %v1693_v24 }
 0x222   : > { %1758 = vst [vmem:[%s3842_s19 + $0x158] sm:$0xff] %v1694_v46 }
 0x223   : > { %1774 = vst [vmem:[%s3842_s19 + $0x1d8] sm:$0xff] %v1710_v5 }
 0x224   : > { %1766 = vst [vmem:[%s3842_s19 + $0x198] sm:$0xff] %v1702_v10  ;;  %v1634_v6 = vpop.permute.xlu0 %1633 }
 0x225   : > { %v1707_v20 = vadd.f32 %v1634_v6, %v1483_v41  ;;  %v1708_v15 = vadd.f32 %v1634_v6, %v1484_v30 }
 0x226   : > { %v1614_v54 = vpop.permute.xlu1 %1613 }
 0x227   : > { %v1699_v53 = vadd.f32 %v1614_v54, %v1475_v52  ;;  %v1700_v36 = vadd.f32 %v1614_v54, %v1476_v19  ;;  %1771 = vst [vmem:[%s3842_s19 + $0x1c0] sm:$0xff] %v1707_v20 }
 0x228   : > { %1772 = vst [vmem:[%s3842_s19 + $0x1c8] sm:$0xff] %v1708_v15 }
 0x229   : > { %1763 = vst [vmem:[%s3842_s19 + $0x180] sm:$0xff] %v1699_v53 }
 0x22a   : > { %1764 = vst [vmem:[%s3842_s19 + $0x188] sm:$0xff] %v1700_v36 }
 0x22c   : > { %v1649_v17 = vpop.permute.xlu0 %1648 }
 0x22d   : > { %v1713_v38 = vadd.f32 %v1649_v17, %v1489_v55  ;;  %v1714_v11 = vadd.f32 %v1649_v17, %v1490_v26 }
 0x22e   : > { %v1629_v33 = vpop.permute.xlu1 %1628 }
 0x22f   : > { %v1705_v43 = vadd.f32 %v1629_v33, %v1481_v58  ;;  %v1706_v13 = vadd.f32 %v1629_v33, %v1482_v32  ;;  %1777 = vst [vmem:[%s3842_s19 + $0x1f0] sm:$0xff] %v1713_v38 }
 0x230   : > { %1778 = vst [vmem:[%s3842_s19 + $0x1f8] sm:$0xff] %v1714_v11 }
 0x231   : > { %1769 = vst [vmem:[%s3842_s19 + $0x1b0] sm:$0xff] %v1705_v43 }
 0x232   : > { %1770 = vst [vmem:[%s3842_s19 + $0x1b8] sm:$0xff] %v1706_v13 }
 0x236   : > { %v1644_v42 = vpop.permute.xlu1 %1643 }
 0x237   : > { %v1711_v50 = vadd.f32 %v1644_v42, %v1487_v14  ;;  %v1712_v35 = vadd.f32 %v1644_v42, %v1488_v40 }
 0x239   : > { %1775 = vst [vmem:[%s3842_s19 + $0x1e0] sm:$0xff] %v1711_v50 }
 0x23a   : > { %1776 = vst [vmem:[%s3842_s19 + $0x1e8] sm:$0xff] %v1712_v35 }
 0x23b   : > { %2153 = shalt.err (!%p2150_p5)
}
 0x23c   : > { %s2207_s10 = smov 256   ;;  %s2208_s11 = smov 16  }
 0x23d   : > { %1937 = dma.vmem_to_hbm [thread:$0]  (%p2269_p4), %s1796_s28, 8192, %s1798_s29, %s1780_s15, %s2207_s10, %s2207_s10, %s2208_s11  }
 0x23e PF: > { %p1943_p6 = scmp.ge.s32.totalorder %s2204_s17, 2  ;;  %s1812_s18 = sand.u32 1, %s2184_s12  }
 0x23f   : > { %s1813_s19 = scalar_lea.sflag [#allocation3], %s1812_s18 }
 0x240   : > { %p1940_p7 = pnand %p1943_p6, %p2276_p8 }
 0x242   : > { %p1941_p9 = pneg %p1940_p7 }
 0x244   : > { %2179 = dma.done.wait (%p1941_p9), %s1813_s19, 8192  }
 0x245   : > { %2181 = vsyncadd (%p1941_p9), %s1813_s19, 4294959104  ;;  %s16_s17 = sadd.s32 1, %s2204_s17   ;;  %s4220_s12 = smov %s2188_s13 }
 0x246   : > { %p13_p10 = scmp.ge.s32.totalorder %s16_s17, 4   ;;  %s4221_s13 = smov %s2192_s14 }
 0x247   : > { %s4222_s14 = smov %s2282_s25  ;;  %s4223_s15 = smov %s2200_s16 }
 0x248   : > { %s4224_s16 = smov %s4226_s20  ;;  %15 = sbr.rel (!%p13_p10) target bundleno = 4 (0x4), region = 73 }
 0x24d   :  { %1819 = vsyncpa [#allocation3], 1 }
 0x24e   :  { %1821 = vsyncpa [#allocation3 + $0x1], 1 }

</bundles_post_ra>
